<compile_context>
chip_gen: v6e
topology: v6e:2x2x1
jax: 0.10.0
libtpu: 0.0.40
codegen_flags: <defaults>
</compile_context>

<pallas_src>
import jax
import jax.numpy as jnp
from jax.experimental import pallas as pl
from jax.experimental.pallas import tpu as pltpu

# ---------------- synthetic tiny-BERT config (deterministic, no checkpoint) ----------------
VOCAB = 100
HIDDEN = 32
LAYERS = 2
HEADS = 4
HEAD_DIM = HIDDEN // HEADS
INTER = 64
MAXPOS = 16
NUM_LABELS = 3
LN_EPS = 1e-12  # BERT default

# Whole-array-in-VMEM spec (shapes here are tiny; block == full array satisfies tiling rules)
VMEM_SPEC = pl.BlockSpec(memory_space=pltpu.MemorySpace.VMEM)


# ---------------- in-kernel helpers ----------------
def _mm(a, b):
    # bf16 MXU operands, f32 accumulation
    return jnp.dot(a.astype(jnp.bfloat16), b.astype(jnp.bfloat16),
                   preferred_element_type=jnp.float32)


def _layernorm(x, g, b):
    mu = jnp.mean(x, axis=-1, keepdims=True)
    var = jnp.mean(jnp.square(x - mu), axis=-1, keepdims=True)
    return (x - mu) * jax.lax.rsqrt(var + LN_EPS) * g + b


def _softmax_rows(s):
    mx = jnp.max(s, axis=-1, keepdims=True)
    e = jnp.exp(s - mx)
    # reciprocal on the EUP slot; denom >= 1 (max element contributes exp(0)=1)
    return e * pl.reciprocal(jnp.sum(e, axis=-1, keepdims=True), approx=True)


# ---------------- the fused BERT forward kernel ----------------
def bert_fused_kernel(tok_ref, pos_typ_ref, emb_g_ref, emb_b_ref, mask_ref,
                      qkv_w_ref, qkv_b_ref, o_w_ref, o_b_ref,
                      ln1_g_ref, ln1_b_ref,
                      ffn_w1_ref, ffn_b1_ref, ffn_w2_ref, ffn_b2_ref,
                      ln2_g_ref, ln2_b_ref,
                      pool_w_ref, pool_b_ref, cls_w_ref, cls_b_ref,
                      onehot_ref,
                      last_ref, logits_ref, loss_ref):
    rows, hid = tok_ref.shape              # (B*S, H)
    num_layers = qkv_w_ref.shape[0]
    batch = onehot_ref.shape[0]
    seq = rows // batch
    scale = 1.0 / (HEAD_DIM ** 0.5)

    # ---- embeddings: token + (position + type) sum fused with LayerNorm ----
    x = tok_ref[...] + pos_typ_ref[...]                       # (B*S, H) f32
    x = _layernorm(x, emb_g_ref[...], emb_b_ref[...])

    # additive mask over flattened keys: 0 for same-batch & kept key, -1e9 otherwise.
    # (A fully-masked row would degenerate to a uniform distribution — same as HF,
    #  and never happens with the inputs used here.)
    mask = mask_ref[...]                                      # (B*S, B*S)

    # ---- encoder layers (static unroll; layer params indexed on the stacked L axis) ----
    for l in range(num_layers):
        qkv = _mm(x, qkv_w_ref[l]) + qkv_b_ref[l]             # (B*S, 3H), fused Q|K|V
        o_w = o_w_ref[l]                                      # (H, H)

        attn = jnp.zeros((rows, hid), jnp.float32)
        for hd in range(HEADS):
            lo = hd * HEAD_DIM
            hi = lo + HEAD_DIM
            q = qkv[:, lo:hi]
            k = qkv[:, hid + lo:hid + hi]
            v = qkv[:, 2 * hid + lo:2 * hid + hi]
            s = jnp.einsum("qd,kd->qk",
                           q.astype(jnp.bfloat16), k.astype(jnp.bfloat16),
                           preferred_element_type=jnp.float32) * scale + mask
            p = _softmax_rows(s)                              # (B*S, B*S)
            ctx = _mm(p, v)                                   # (B*S, Dh)
            # fold the output projection per head: attn += ctx_h @ W_o[h*Dh:(h+1)*Dh, :]
            attn = attn + _mm(ctx, o_w[lo:hi, :])
        attn = attn + o_b_ref[l]

        h1 = _layernorm(attn + x, ln1_g_ref[l], ln1_b_ref[l])
        ff = _mm(h1, ffn_w1_ref[l]) + ffn_b1_ref[l]
        ff = jax.nn.gelu(ff, approximate=True)                # TODO(synk): erf-GELU in HF BERT
        ff = _mm(ff, ffn_w2_ref[l]) + ffn_b2_ref[l]
        x = _layernorm(ff + h1, ln2_g_ref[l], ln2_b_ref[l])

    last_ref[...] = x                                         # (B*S, H)

    # ---- pooler + classifier + cross-entropy (all in-kernel) ----
    # CLS-token extraction (rows b*seq) via a one-hot selection matmul (robust lowering)
    row_ids = jax.lax.broadcasted_iota(jnp.int32, (batch, rows), 0)
    col_ids = jax.lax.broadcasted_iota(jnp.int32, (batch, rows), 1)
    sel = (col_ids == row_ids * seq).astype(jnp.float32)      # (B, B*S)
    cls = _mm(sel, x)                                         # (B, H)

    pooled = jnp.tanh(_mm(cls, pool_w_ref[...]) + pool_b_ref[...])
    logits = _mm(pooled, cls_w_ref[...]) + cls_b_ref[...]     # (B, NUM_LABELS)
    logits_ref[...] = logits

    # mean cross-entropy (matches nn.CrossEntropyLoss default reduction);
    # the wrapper drops the value when labels is None.
    mx = jnp.max(logits, axis=-1, keepdims=True)
    lse = jnp.log(jnp.sum(jnp.exp(logits - mx), axis=-1, keepdims=True)) + mx
    nll = lse - jnp.sum(logits * onehot_ref[...], axis=-1, keepdims=True)   # (B,1)
    loss_ref[...] = jnp.sum(nll, axis=0, keepdims=True) / batch


# ---------------- parameter init (deterministic, synthetic) ----------------
def init_params(key):
    keys = iter(jax.random.split(key, 16 + 16 * LAYERS))

    def nrm(shape, scale=0.02):
        return scale * jax.random.normal(next(keys), shape, dtype=jnp.float32)

    params = {
        "word_emb": nrm((VOCAB, HIDDEN)),
        "pos_emb": nrm((MAXPOS, HIDDEN)),
        "type_emb": nrm((2, HIDDEN)),
        "emb_ln_g": jnp.ones((HIDDEN,), jnp.float32),
        "emb_ln_b": jnp.zeros((HIDDEN,), jnp.float32),
        "pool_w": nrm((HIDDEN, HIDDEN)),
        "pool_b": jnp.zeros((HIDDEN,), jnp.float32),
        "cls_w": nrm((HIDDEN, NUM_LABELS)),
        "cls_b": jnp.zeros((NUM_LABELS,), jnp.float32),
        "layers": [],
    }
    for _ in range(LAYERS):
        params["layers"].append({
            "q_w": nrm((HIDDEN, HIDDEN)), "q_b": jnp.zeros((HIDDEN,), jnp.float32),
            "k_w": nrm((HIDDEN, HIDDEN)), "k_b": jnp.zeros((HIDDEN,), jnp.float32),
            "v_w": nrm((HIDDEN, HIDDEN)), "v_b": jnp.zeros((HIDDEN,), jnp.float32),
            "o_w": nrm((HIDDEN, HIDDEN)), "o_b": jnp.zeros((HIDDEN,), jnp.float32),
            "ln1_g": jnp.ones((HIDDEN,), jnp.float32), "ln1_b": jnp.zeros((HIDDEN,), jnp.float32),
            "ffn_w1": nrm((HIDDEN, INTER)), "ffn_b1": jnp.zeros((INTER,), jnp.float32),
            "ffn_w2": nrm((INTER, HIDDEN)), "ffn_b2": jnp.zeros((HIDDEN,), jnp.float32),
            "ln2_g": jnp.ones((HIDDEN,), jnp.float32), "ln2_b": jnp.zeros((HIDDEN,), jnp.float32),
        })
    return params


# ---------------- forward pass (mirrors BertForFineTuning.forward) ----------------
def bert_for_fine_tuning(params, input_ids, attention_mask, labels=None):
    B, S = input_ids.shape
    H = HIDDEN

    # ---- glue: embedding gather + parameter-only packing (no activation round-trips) ----
    tok = params["word_emb"][input_ids].reshape(B * S, H)                 # (B*S, H)
    pos_typ = (jnp.tile(params["pos_emb"][:S], (B, 1))
               + params["type_emb"][0][None, :])                          # (B*S, H)

    # block-diagonal-per-batch additive mask over the flattened (B*S) key axis
    am = attention_mask.astype(jnp.float32)                               # (B, S)
    same_batch = jnp.kron(jnp.eye(B, dtype=jnp.float32),
                          jnp.ones((S, S), jnp.float32))                  # (B*S, B*S)
    allowed = same_batch * am.reshape(1, B * S)
    mask2d = (1.0 - allowed) * (-1e9)                                     # (B*S, B*S)

    layers = params["layers"]
    stack_w = lambda name: jnp.stack([lp[name] for lp in layers])         # (L, ., .)
    stack_v = lambda name: jnp.stack([lp[name][None, :] for lp in layers])  # (L, 1, .)

    qkv_w = jnp.stack([jnp.concatenate([lp["q_w"], lp["k_w"], lp["v_w"]], axis=1)
                       for lp in layers])                                 # (L, H, 3H)
    qkv_b = jnp.stack([jnp.concatenate([lp["q_b"], lp["k_b"], lp["v_b"]])[None, :]
                       for lp in layers])                                 # (L, 1, 3H)
    o_w = stack_w("o_w"); o_b = stack_v("o_b")
    ln1_g = stack_v("ln1_g"); ln1_b = stack_v("ln1_b")
    ffn_w1 = stack_w("ffn_w1"); ffn_b1 = stack_v("ffn_b1")
    ffn_w2 = stack_w("ffn_w2"); ffn_b2 = stack_v("ffn_b2")
    ln2_g = stack_v("ln2_g"); ln2_b = stack_v("ln2_b")

    if labels is not None:
        onehot = jax.nn.one_hot(labels, NUM_LABELS, dtype=jnp.float32)
    else:
        onehot = jnp.zeros((B, NUM_LABELS), jnp.float32)

    last2d, logits, loss11 = pl.pallas_call(
        bert_fused_kernel,
        out_shape=(
            jax.ShapeDtypeStruct((B * S, H), jnp.float32),       # last hidden states
            jax.ShapeDtypeStruct((B, NUM_LABELS), jnp.float32),  # logits
            jax.ShapeDtypeStruct((1, 1), jnp.float32),           # mean CE loss
        ),
        in_specs=[VMEM_SPEC] * 22,
        out_specs=(VMEM_SPEC, VMEM_SPEC, VMEM_SPEC),
    )(tok, pos_typ,
      params["emb_ln_g"][None, :], params["emb_ln_b"][None, :],
      mask2d,
      qkv_w, qkv_b, o_w, o_b,
      ln1_g, ln1_b, ffn_w1, ffn_b1, ffn_w2, ffn_b2, ln2_g, ln2_b,
      params["pool_w"], params["pool_b"][None, :],
      params["cls_w"], params["cls_b"][None, :],
      onehot)

    last_hidden_state = last2d.reshape(B, S, H)
    loss = loss11[0, 0] if labels is not None else None
    return loss, logits, last_hidden_state


# ---------------- main ----------------
if __name__ == "__main__":
    key = jax.random.PRNGKey(0)
    k_params, k_ids, k_lab = jax.random.split(key, 3)

    B, S = 2, 8
    params = init_params(k_params)
    input_ids = jax.random.randint(k_ids, (B, S), 0, VOCAB, dtype=jnp.int32)
    attention_mask = jnp.array([[1, 1, 1, 1, 1, 1, 1, 1],
                                [1, 1, 1, 1, 1, 1, 0, 0]], dtype=jnp.int32)
    labels = jax.random.randint(k_lab, (B,), 0, NUM_LABELS, dtype=jnp.int32)

    loss, logits, last_hidden = bert_for_fine_tuning(params, input_ids, attention_mask, labels)
    jax.block_until_ready((loss, logits, last_hidden))
    assert logits.shape == (B, NUM_LABELS)
    assert last_hidden.shape == (B, S, HIDDEN)
    assert loss.shape == ()
    assert bool(jnp.isfinite(loss))
    print("KERNEL_OK")
</pallas_src>

<mosaic_0001>
module attributes {stable_mosaic.version = 11 : i64} {
  func.func @bert_fused_kernel(%arg0: memref<16x32xf32, #tpu.memory_space<vmem>>, %arg1: memref<16x32xf32, #tpu.memory_space<vmem>>, %arg2: memref<1x32xf32, #tpu.memory_space<vmem>>, %arg3: memref<1x32xf32, #tpu.memory_space<vmem>>, %arg4: memref<16x16xf32, #tpu.memory_space<vmem>>, %arg5: memref<2x32x96xf32, #tpu.memory_space<vmem>>, %arg6: memref<2x1x96xf32, #tpu.memory_space<vmem>>, %arg7: memref<2x32x32xf32, #tpu.memory_space<vmem>>, %arg8: memref<2x1x32xf32, #tpu.memory_space<vmem>>, %arg9: memref<2x1x32xf32, #tpu.memory_space<vmem>>, %arg10: memref<2x1x32xf32, #tpu.memory_space<vmem>>, %arg11: memref<2x32x64xf32, #tpu.memory_space<vmem>>, %arg12: memref<2x1x64xf32, #tpu.memory_space<vmem>>, %arg13: memref<2x64x32xf32, #tpu.memory_space<vmem>>, %arg14: memref<2x1x32xf32, #tpu.memory_space<vmem>>, %arg15: memref<2x1x32xf32, #tpu.memory_space<vmem>>, %arg16: memref<2x1x32xf32, #tpu.memory_space<vmem>>, %arg17: memref<32x32xf32, #tpu.memory_space<vmem>>, %arg18: memref<1x32xf32, #tpu.memory_space<vmem>>, %arg19: memref<32x3xf32, #tpu.memory_space<vmem>>, %arg20: memref<1x3xf32, #tpu.memory_space<vmem>>, %arg21: memref<2x3xf32, #tpu.memory_space<vmem>>, %arg22: memref<16x32xf32, #tpu.memory_space<vmem>>, %arg23: memref<2x3xf32, #tpu.memory_space<vmem>>, %arg24: memref<1x1xf32, #tpu.memory_space<vmem>>) attributes {dimension_semantics = [], scalar_prefetch = 0 : i64, scratch_operands = 0 : i64, tpu.core_type = #tpu.core_type<tc>} {
    %c0 = arith.constant 0 : index
    %c0_0 = arith.constant 0 : index
    %0 = vector.load %arg0[%c0, %c0_0] : memref<16x32xf32, #tpu.memory_space<vmem>>, vector<16x32xf32>
    %c0_1 = arith.constant 0 : index
    %c0_2 = arith.constant 0 : index
    %1 = vector.load %arg1[%c0_1, %c0_2] : memref<16x32xf32, #tpu.memory_space<vmem>>, vector<16x32xf32>
    %2 = arith.addf %0, %1 : vector<16x32xf32>
    %c0_3 = arith.constant 0 : index
    %c0_4 = arith.constant 0 : index
    %3 = vector.load %arg2[%c0_3, %c0_4] : memref<1x32xf32, #tpu.memory_space<vmem>>, vector<1x32xf32>
    %c0_5 = arith.constant 0 : index
    %c0_6 = arith.constant 0 : index
    %4 = vector.load %arg3[%c0_5, %c0_6] : memref<1x32xf32, #tpu.memory_space<vmem>>, vector<1x32xf32>
    %cst = arith.constant dense<0.000000e+00> : vector<16xf32>
    %5 = vector.multi_reduction <add>, %2, %cst [1] : vector<16x32xf32> to vector<16xf32>
    %6 = vector.shape_cast %5 : vector<16xf32> to vector<16x1xf32>
    %cst_7 = arith.constant 3.200000e+01 : f32
    %7 = vector.broadcast %cst_7 : f32 to vector<16x1xf32>
    %8 = arith.divf %6, %7 : vector<16x1xf32>
    %9 = vector.broadcast %8 : vector<16x1xf32> to vector<16x32xf32>
    %10 = arith.subf %2, %9 : vector<16x32xf32>
    %11 = arith.mulf %10, %10 : vector<16x32xf32>
    %cst_8 = arith.constant dense<0.000000e+00> : vector<16xf32>
    %12 = vector.multi_reduction <add>, %11, %cst_8 [1] : vector<16x32xf32> to vector<16xf32>
    %13 = vector.shape_cast %12 : vector<16xf32> to vector<16x1xf32>
    %cst_9 = arith.constant 3.200000e+01 : f32
    %14 = vector.broadcast %cst_9 : f32 to vector<16x1xf32>
    %15 = arith.divf %13, %14 : vector<16x1xf32>
    %16 = vector.broadcast %8 : vector<16x1xf32> to vector<16x32xf32>
    %17 = arith.subf %2, %16 : vector<16x32xf32>
    %cst_10 = arith.constant 9.99999996E-13 : f32
    %18 = vector.broadcast %cst_10 : f32 to vector<16x1xf32>
    %19 = arith.addf %15, %18 : vector<16x1xf32>
    %20 = math.rsqrt %19 : vector<16x1xf32>
    %21 = vector.broadcast %20 : vector<16x1xf32> to vector<16x32xf32>
    %22 = arith.mulf %17, %21 : vector<16x32xf32>
    %23 = vector.broadcast %3 : vector<1x32xf32> to vector<16x32xf32>
    %24 = arith.mulf %22, %23 : vector<16x32xf32>
    %25 = vector.broadcast %4 : vector<1x32xf32> to vector<16x32xf32>
    %26 = arith.addf %24, %25 : vector<16x32xf32>
    %c0_11 = arith.constant 0 : index
    %c0_12 = arith.constant 0 : index
    %27 = vector.load %arg4[%c0_11, %c0_12] : memref<16x16xf32, #tpu.memory_space<vmem>>, vector<16x16xf32>
    %c0_13 = arith.constant 0 : index
    %c0_14 = arith.constant 0 : index
    %c0_15 = arith.constant 0 : index
    %28 = vector.load %arg5[%c0_13, %c0_14, %c0_15] : memref<2x32x96xf32, #tpu.memory_space<vmem>>, vector<1x32x96xf32>
    %29 = vector.shape_cast %28 : vector<1x32x96xf32> to vector<32x96xf32>
    %30 = arith.truncf %26 : vector<16x32xf32> to vector<16x32xbf16>
    %31 = arith.truncf %29 : vector<32x96xf32> to vector<32x96xbf16>
    %cst_16 = arith.constant dense<0.000000e+00> : vector<16x96xf32>
    %32 = tpu.matmul %30, %31, %cst_16 {dimension_numbers = #tpu.dot_dimension_numbers<[1], [0], [0], [1], [0, 0, 1, 1], [], []>} : vector<16x32xbf16>, vector<32x96xbf16>, vector<16x96xf32> -> vector<16x96xf32>
    %c0_17 = arith.constant 0 : index
    %c0_18 = arith.constant 0 : index
    %c0_19 = arith.constant 0 : index
    %33 = vector.load %arg6[%c0_17, %c0_18, %c0_19] : memref<2x1x96xf32, #tpu.memory_space<vmem>>, vector<1x1x96xf32>
    %34 = vector.shape_cast %33 : vector<1x1x96xf32> to vector<1x96xf32>
    %35 = vector.broadcast %34 : vector<1x96xf32> to vector<16x96xf32>
    %36 = arith.addf %32, %35 : vector<16x96xf32>
    %c0_20 = arith.constant 0 : index
    %c0_21 = arith.constant 0 : index
    %c0_22 = arith.constant 0 : index
    %37 = vector.load %arg7[%c0_20, %c0_21, %c0_22] : memref<2x32x32xf32, #tpu.memory_space<vmem>>, vector<1x32x32xf32>
    %38 = vector.shape_cast %37 : vector<1x32x32xf32> to vector<32x32xf32>
    %cst_23 = arith.constant 0.000000e+00 : f32
    %39 = vector.broadcast %cst_23 : f32 to vector<16x32xf32>
    %40 = vector.extract_strided_slice %36 {offsets = [0, 0], sizes = [16, 8], strides = [1, 1]} : vector<16x96xf32> to vector<16x8xf32>
    %41 = vector.extract_strided_slice %36 {offsets = [0, 32], sizes = [16, 8], strides = [1, 1]} : vector<16x96xf32> to vector<16x8xf32>
    %42 = vector.extract_strided_slice %36 {offsets = [0, 64], sizes = [16, 8], strides = [1, 1]} : vector<16x96xf32> to vector<16x8xf32>
    %43 = arith.truncf %40 : vector<16x8xf32> to vector<16x8xbf16>
    %44 = arith.truncf %41 : vector<16x8xf32> to vector<16x8xbf16>
    "tpu.trace_start"() <{level = 10 : i32, message = "qd,kd->qk"}> : () -> ()
    %cst_24 = arith.constant dense<0.000000e+00> : vector<16x16xf32>
    %45 = tpu.matmul %43, %44, %cst_24 {dimension_numbers = #tpu.dot_dimension_numbers<[1], [1], [0], [0], [0, 0, 1, 0], [], []>} : vector<16x8xbf16>, vector<16x8xbf16>, vector<16x16xf32> -> vector<16x16xf32>
    "tpu.trace_stop"() : () -> ()
    %cst_25 = arith.constant 0.353553385 : f32
    %46 = vector.broadcast %cst_25 : f32 to vector<16x16xf32>
    %47 = arith.mulf %45, %46 : vector<16x16xf32>
    %48 = arith.addf %47, %27 : vector<16x16xf32>
    %cst_26 = arith.constant dense<0xFF800000> : vector<16xf32>
    %49 = vector.multi_reduction <maximumf>, %48, %cst_26 [1] : vector<16x16xf32> to vector<16xf32>
    %50 = vector.shape_cast %49 : vector<16xf32> to vector<16x1xf32>
    %51 = vector.broadcast %50 : vector<16x1xf32> to vector<16x16xf32>
    %52 = arith.subf %48, %51 : vector<16x16xf32>
    %53 = math.exp %52 : vector<16x16xf32>
    %cst_27 = arith.constant dense<0.000000e+00> : vector<16xf32>
    %54 = vector.multi_reduction <add>, %53, %cst_27 [1] : vector<16x16xf32> to vector<16xf32>
    %55 = vector.shape_cast %54 : vector<16xf32> to vector<16x1xf32>
    %56 = tpu.reciprocal %55 {approx = true} : vector<16x1xf32> -> vector<16x1xf32>
    %57 = vector.broadcast %56 : vector<16x1xf32> to vector<16x16xf32>
    %58 = arith.mulf %53, %57 : vector<16x16xf32>
    %59 = arith.truncf %58 : vector<16x16xf32> to vector<16x16xbf16>
    %60 = arith.truncf %42 : vector<16x8xf32> to vector<16x8xbf16>
    %cst_28 = arith.constant dense<0.000000e+00> : vector<16x8xf32>
    %61 = tpu.matmul %59, %60, %cst_28 {dimension_numbers = #tpu.dot_dimension_numbers<[1], [0], [0], [1], [0, 0, 1, 1], [], []>} : vector<16x16xbf16>, vector<16x8xbf16>, vector<16x8xf32> -> vector<16x8xf32>
    %62 = vector.extract_strided_slice %38 {offsets = [0, 0], sizes = [8, 32], strides = [1, 1]} : vector<32x32xf32> to vector<8x32xf32>
    %63 = arith.truncf %61 : vector<16x8xf32> to vector<16x8xbf16>
    %64 = arith.truncf %62 : vector<8x32xf32> to vector<8x32xbf16>
    %cst_29 = arith.constant dense<0.000000e+00> : vector<16x32xf32>
    %65 = tpu.matmul %63, %64, %cst_29 {dimension_numbers = #tpu.dot_dimension_numbers<[1], [0], [0], [1], [0, 0, 1, 1], [], []>} : vector<16x8xbf16>, vector<8x32xbf16>, vector<16x32xf32> -> vector<16x32xf32>
    %66 = arith.addf %39, %65 : vector<16x32xf32>
    %67 = vector.extract_strided_slice %36 {offsets = [0, 8], sizes = [16, 8], strides = [1, 1]} : vector<16x96xf32> to vector<16x8xf32>
    %68 = vector.extract_strided_slice %36 {offsets = [0, 40], sizes = [16, 8], strides = [1, 1]} : vector<16x96xf32> to vector<16x8xf32>
    %69 = vector.extract_strided_slice %36 {offsets = [0, 72], sizes = [16, 8], strides = [1, 1]} : vector<16x96xf32> to vector<16x8xf32>
    %70 = arith.truncf %67 : vector<16x8xf32> to vector<16x8xbf16>
    %71 = arith.truncf %68 : vector<16x8xf32> to vector<16x8xbf16>
    "tpu.trace_start"() <{level = 10 : i32, message = "qd,kd->qk"}> : () -> ()
    %cst_30 = arith.constant dense<0.000000e+00> : vector<16x16xf32>
    %72 = tpu.matmul %70, %71, %cst_30 {dimension_numbers = #tpu.dot_dimension_numbers<[1], [1], [0], [0], [0, 0, 1, 0], [], []>} : vector<16x8xbf16>, vector<16x8xbf16>, vector<16x16xf32> -> vector<16x16xf32>
    "tpu.trace_stop"() : () -> ()
    %cst_31 = arith.constant 0.353553385 : f32
    %73 = vector.broadcast %cst_31 : f32 to vector<16x16xf32>
    %74 = arith.mulf %72, %73 : vector<16x16xf32>
    %75 = arith.addf %74, %27 : vector<16x16xf32>
    %cst_32 = arith.constant dense<0xFF800000> : vector<16xf32>
    %76 = vector.multi_reduction <maximumf>, %75, %cst_32 [1] : vector<16x16xf32> to vector<16xf32>
    %77 = vector.shape_cast %76 : vector<16xf32> to vector<16x1xf32>
    %78 = vector.broadcast %77 : vector<16x1xf32> to vector<16x16xf32>
    %79 = arith.subf %75, %78 : vector<16x16xf32>
    %80 = math.exp %79 : vector<16x16xf32>
    %cst_33 = arith.constant dense<0.000000e+00> : vector<16xf32>
    %81 = vector.multi_reduction <add>, %80, %cst_33 [1] : vector<16x16xf32> to vector<16xf32>
    %82 = vector.shape_cast %81 : vector<16xf32> to vector<16x1xf32>
    %83 = tpu.reciprocal %82 {approx = true} : vector<16x1xf32> -> vector<16x1xf32>
    %84 = vector.broadcast %83 : vector<16x1xf32> to vector<16x16xf32>
    %85 = arith.mulf %80, %84 : vector<16x16xf32>
    %86 = arith.truncf %85 : vector<16x16xf32> to vector<16x16xbf16>
    %87 = arith.truncf %69 : vector<16x8xf32> to vector<16x8xbf16>
    %cst_34 = arith.constant dense<0.000000e+00> : vector<16x8xf32>
    %88 = tpu.matmul %86, %87, %cst_34 {dimension_numbers = #tpu.dot_dimension_numbers<[1], [0], [0], [1], [0, 0, 1, 1], [], []>} : vector<16x16xbf16>, vector<16x8xbf16>, vector<16x8xf32> -> vector<16x8xf32>
    %89 = vector.extract_strided_slice %38 {offsets = [8, 0], sizes = [8, 32], strides = [1, 1]} : vector<32x32xf32> to vector<8x32xf32>
    %90 = arith.truncf %88 : vector<16x8xf32> to vector<16x8xbf16>
    %91 = arith.truncf %89 : vector<8x32xf32> to vector<8x32xbf16>
    %cst_35 = arith.constant dense<0.000000e+00> : vector<16x32xf32>
    %92 = tpu.matmul %90, %91, %cst_35 {dimension_numbers = #tpu.dot_dimension_numbers<[1], [0], [0], [1], [0, 0, 1, 1], [], []>} : vector<16x8xbf16>, vector<8x32xbf16>, vector<16x32xf32> -> vector<16x32xf32>
    %93 = arith.addf %66, %92 : vector<16x32xf32>
    %94 = vector.extract_strided_slice %36 {offsets = [0, 16], sizes = [16, 8], strides = [1, 1]} : vector<16x96xf32> to vector<16x8xf32>
    %95 = vector.extract_strided_slice %36 {offsets = [0, 48], sizes = [16, 8], strides = [1, 1]} : vector<16x96xf32> to vector<16x8xf32>
    %96 = vector.extract_strided_slice %36 {offsets = [0, 80], sizes = [16, 8], strides = [1, 1]} : vector<16x96xf32> to vector<16x8xf32>
    %97 = arith.truncf %94 : vector<16x8xf32> to vector<16x8xbf16>
    %98 = arith.truncf %95 : vector<16x8xf32> to vector<16x8xbf16>
    "tpu.trace_start"() <{level = 10 : i32, message = "qd,kd->qk"}> : () -> ()
    %cst_36 = arith.constant dense<0.000000e+00> : vector<16x16xf32>
    %99 = tpu.matmul %97, %98, %cst_36 {dimension_numbers = #tpu.dot_dimension_numbers<[1], [1], [0], [0], [0, 0, 1, 0], [], []>} : vector<16x8xbf16>, vector<16x8xbf16>, vector<16x16xf32> -> vector<16x16xf32>
    "tpu.trace_stop"() : () -> ()
    %cst_37 = arith.constant 0.353553385 : f32
    %100 = vector.broadcast %cst_37 : f32 to vector<16x16xf32>
    %101 = arith.mulf %99, %100 : vector<16x16xf32>
    %102 = arith.addf %101, %27 : vector<16x16xf32>
    %cst_38 = arith.constant dense<0xFF800000> : vector<16xf32>
    %103 = vector.multi_reduction <maximumf>, %102, %cst_38 [1] : vector<16x16xf32> to vector<16xf32>
    %104 = vector.shape_cast %103 : vector<16xf32> to vector<16x1xf32>
    %105 = vector.broadcast %104 : vector<16x1xf32> to vector<16x16xf32>
    %106 = arith.subf %102, %105 : vector<16x16xf32>
    %107 = math.exp %106 : vector<16x16xf32>
    %cst_39 = arith.constant dense<0.000000e+00> : vector<16xf32>
    %108 = vector.multi_reduction <add>, %107, %cst_39 [1] : vector<16x16xf32> to vector<16xf32>
    %109 = vector.shape_cast %108 : vector<16xf32> to vector<16x1xf32>
    %110 = tpu.reciprocal %109 {approx = true} : vector<16x1xf32> -> vector<16x1xf32>
    %111 = vector.broadcast %110 : vector<16x1xf32> to vector<16x16xf32>
    %112 = arith.mulf %107, %111 : vector<16x16xf32>
    %113 = arith.truncf %112 : vector<16x16xf32> to vector<16x16xbf16>
    %114 = arith.truncf %96 : vector<16x8xf32> to vector<16x8xbf16>
    %cst_40 = arith.constant dense<0.000000e+00> : vector<16x8xf32>
    %115 = tpu.matmul %113, %114, %cst_40 {dimension_numbers = #tpu.dot_dimension_numbers<[1], [0], [0], [1], [0, 0, 1, 1], [], []>} : vector<16x16xbf16>, vector<16x8xbf16>, vector<16x8xf32> -> vector<16x8xf32>
    %116 = vector.extract_strided_slice %38 {offsets = [16, 0], sizes = [8, 32], strides = [1, 1]} : vector<32x32xf32> to vector<8x32xf32>
    %117 = arith.truncf %115 : vector<16x8xf32> to vector<16x8xbf16>
    %118 = arith.truncf %116 : vector<8x32xf32> to vector<8x32xbf16>
    %cst_41 = arith.constant dense<0.000000e+00> : vector<16x32xf32>
    %119 = tpu.matmul %117, %118, %cst_41 {dimension_numbers = #tpu.dot_dimension_numbers<[1], [0], [0], [1], [0, 0, 1, 1], [], []>} : vector<16x8xbf16>, vector<8x32xbf16>, vector<16x32xf32> -> vector<16x32xf32>
    %120 = arith.addf %93, %119 : vector<16x32xf32>
    %121 = vector.extract_strided_slice %36 {offsets = [0, 24], sizes = [16, 8], strides = [1, 1]} : vector<16x96xf32> to vector<16x8xf32>
    %122 = vector.extract_strided_slice %36 {offsets = [0, 56], sizes = [16, 8], strides = [1, 1]} : vector<16x96xf32> to vector<16x8xf32>
    %123 = vector.extract_strided_slice %36 {offsets = [0, 88], sizes = [16, 8], strides = [1, 1]} : vector<16x96xf32> to vector<16x8xf32>
    %124 = arith.truncf %121 : vector<16x8xf32> to vector<16x8xbf16>
    %125 = arith.truncf %122 : vector<16x8xf32> to vector<16x8xbf16>
    "tpu.trace_start"() <{level = 10 : i32, message = "qd,kd->qk"}> : () -> ()
    %cst_42 = arith.constant dense<0.000000e+00> : vector<16x16xf32>
    %126 = tpu.matmul %124, %125, %cst_42 {dimension_numbers = #tpu.dot_dimension_numbers<[1], [1], [0], [0], [0, 0, 1, 0], [], []>} : vector<16x8xbf16>, vector<16x8xbf16>, vector<16x16xf32> -> vector<16x16xf32>
    "tpu.trace_stop"() : () -> ()
    %cst_43 = arith.constant 0.353553385 : f32
    %127 = vector.broadcast %cst_43 : f32 to vector<16x16xf32>
    %128 = arith.mulf %126, %127 : vector<16x16xf32>
    %129 = arith.addf %128, %27 : vector<16x16xf32>
    %cst_44 = arith.constant dense<0xFF800000> : vector<16xf32>
    %130 = vector.multi_reduction <maximumf>, %129, %cst_44 [1] : vector<16x16xf32> to vector<16xf32>
    %131 = vector.shape_cast %130 : vector<16xf32> to vector<16x1xf32>
    %132 = vector.broadcast %131 : vector<16x1xf32> to vector<16x16xf32>
    %133 = arith.subf %129, %132 : vector<16x16xf32>
    %134 = math.exp %133 : vector<16x16xf32>
    %cst_45 = arith.constant dense<0.000000e+00> : vector<16xf32>
    %135 = vector.multi_reduction <add>, %134, %cst_45 [1] : vector<16x16xf32> to vector<16xf32>
    %136 = vector.shape_cast %135 : vector<16xf32> to vector<16x1xf32>
    %137 = tpu.reciprocal %136 {approx = true} : vector<16x1xf32> -> vector<16x1xf32>
    %138 = vector.broadcast %137 : vector<16x1xf32> to vector<16x16xf32>
    %139 = arith.mulf %134, %138 : vector<16x16xf32>
    %140 = arith.truncf %139 : vector<16x16xf32> to vector<16x16xbf16>
    %141 = arith.truncf %123 : vector<16x8xf32> to vector<16x8xbf16>
    %cst_46 = arith.constant dense<0.000000e+00> : vector<16x8xf32>
    %142 = tpu.matmul %140, %141, %cst_46 {dimension_numbers = #tpu.dot_dimension_numbers<[1], [0], [0], [1], [0, 0, 1, 1], [], []>} : vector<16x16xbf16>, vector<16x8xbf16>, vector<16x8xf32> -> vector<16x8xf32>
    %143 = vector.extract_strided_slice %38 {offsets = [24, 0], sizes = [8, 32], strides = [1, 1]} : vector<32x32xf32> to vector<8x32xf32>
    %144 = arith.truncf %142 : vector<16x8xf32> to vector<16x8xbf16>
    %145 = arith.truncf %143 : vector<8x32xf32> to vector<8x32xbf16>
    %cst_47 = arith.constant dense<0.000000e+00> : vector<16x32xf32>
    %146 = tpu.matmul %144, %145, %cst_47 {dimension_numbers = #tpu.dot_dimension_numbers<[1], [0], [0], [1], [0, 0, 1, 1], [], []>} : vector<16x8xbf16>, vector<8x32xbf16>, vector<16x32xf32> -> vector<16x32xf32>
    %147 = arith.addf %120, %146 : vector<16x32xf32>
    %c0_48 = arith.constant 0 : index
    %c0_49 = arith.constant 0 : index
    %c0_50 = arith.constant 0 : index
    %148 = vector.load %arg8[%c0_48, %c0_49, %c0_50] : memref<2x1x32xf32, #tpu.memory_space<vmem>>, vector<1x1x32xf32>
    %149 = vector.shape_cast %148 : vector<1x1x32xf32> to vector<1x32xf32>
    %150 = vector.broadcast %149 : vector<1x32xf32> to vector<16x32xf32>
    %151 = arith.addf %147, %150 : vector<16x32xf32>
    %152 = arith.addf %151, %26 : vector<16x32xf32>
    %c0_51 = arith.constant 0 : index
    %c0_52 = arith.constant 0 : index
    %c0_53 = arith.constant 0 : index
    %153 = vector.load %arg9[%c0_51, %c0_52, %c0_53] : memref<2x1x32xf32, #tpu.memory_space<vmem>>, vector<1x1x32xf32>
    %154 = vector.shape_cast %153 : vector<1x1x32xf32> to vector<1x32xf32>
    %c0_54 = arith.constant 0 : index
    %c0_55 = arith.constant 0 : index
    %c0_56 = arith.constant 0 : index
    %155 = vector.load %arg10[%c0_54, %c0_55, %c0_56] : memref<2x1x32xf32, #tpu.memory_space<vmem>>, vector<1x1x32xf32>
    %156 = vector.shape_cast %155 : vector<1x1x32xf32> to vector<1x32xf32>
    %cst_57 = arith.constant dense<0.000000e+00> : vector<16xf32>
    %157 = vector.multi_reduction <add>, %152, %cst_57 [1] : vector<16x32xf32> to vector<16xf32>
    %158 = vector.shape_cast %157 : vector<16xf32> to vector<16x1xf32>
    %cst_58 = arith.constant 3.200000e+01 : f32
    %159 = vector.broadcast %cst_58 : f32 to vector<16x1xf32>
    %160 = arith.divf %158, %159 : vector<16x1xf32>
    %161 = vector.broadcast %160 : vector<16x1xf32> to vector<16x32xf32>
    %162 = arith.subf %152, %161 : vector<16x32xf32>
    %163 = arith.mulf %162, %162 : vector<16x32xf32>
    %cst_59 = arith.constant dense<0.000000e+00> : vector<16xf32>
    %164 = vector.multi_reduction <add>, %163, %cst_59 [1] : vector<16x32xf32> to vector<16xf32>
    %165 = vector.shape_cast %164 : vector<16xf32> to vector<16x1xf32>
    %cst_60 = arith.constant 3.200000e+01 : f32
    %166 = vector.broadcast %cst_60 : f32 to vector<16x1xf32>
    %167 = arith.divf %165, %166 : vector<16x1xf32>
    %168 = vector.broadcast %160 : vector<16x1xf32> to vector<16x32xf32>
    %169 = arith.subf %152, %168 : vector<16x32xf32>
    %cst_61 = arith.constant 9.99999996E-13 : f32
    %170 = vector.broadcast %cst_61 : f32 to vector<16x1xf32>
    %171 = arith.addf %167, %170 : vector<16x1xf32>
    %172 = math.rsqrt %171 : vector<16x1xf32>
    %173 = vector.broadcast %172 : vector<16x1xf32> to vector<16x32xf32>
    %174 = arith.mulf %169, %173 : vector<16x32xf32>
    %175 = vector.broadcast %154 : vector<1x32xf32> to vector<16x32xf32>
    %176 = arith.mulf %174, %175 : vector<16x32xf32>
    %177 = vector.broadcast %156 : vector<1x32xf32> to vector<16x32xf32>
    %178 = arith.addf %176, %177 : vector<16x32xf32>
    %c0_62 = arith.constant 0 : index
    %c0_63 = arith.constant 0 : index
    %c0_64 = arith.constant 0 : index
    %179 = vector.load %arg11[%c0_62, %c0_63, %c0_64] : memref<2x32x64xf32, #tpu.memory_space<vmem>>, vector<1x32x64xf32>
    %180 = vector.shape_cast %179 : vector<1x32x64xf32> to vector<32x64xf32>
    %181 = arith.truncf %178 : vector<16x32xf32> to vector<16x32xbf16>
    %182 = arith.truncf %180 : vector<32x64xf32> to vector<32x64xbf16>
    %cst_65 = arith.constant dense<0.000000e+00> : vector<16x64xf32>
    %183 = tpu.matmul %181, %182, %cst_65 {dimension_numbers = #tpu.dot_dimension_numbers<[1], [0], [0], [1], [0, 0, 1, 1], [], []>} : vector<16x32xbf16>, vector<32x64xbf16>, vector<16x64xf32> -> vector<16x64xf32>
    %c0_66 = arith.constant 0 : index
    %c0_67 = arith.constant 0 : index
    %c0_68 = arith.constant 0 : index
    %184 = vector.load %arg12[%c0_66, %c0_67, %c0_68] : memref<2x1x64xf32, #tpu.memory_space<vmem>>, vector<1x1x64xf32>
    %185 = vector.shape_cast %184 : vector<1x1x64xf32> to vector<1x64xf32>
    %186 = vector.broadcast %185 : vector<1x64xf32> to vector<16x64xf32>
    %187 = arith.addf %183, %186 : vector<16x64xf32>
    %188 = arith.mulf %187, %187 : vector<16x64xf32>
    %189 = arith.mulf %187, %188 : vector<16x64xf32>
    %cst_69 = arith.constant 4.471500e-02 : f32
    %190 = vector.broadcast %cst_69 : f32 to vector<16x64xf32>
    %191 = arith.mulf %190, %189 : vector<16x64xf32>
    %192 = arith.addf %187, %191 : vector<16x64xf32>
    %cst_70 = arith.constant 0.797884583 : f32
    %193 = vector.broadcast %cst_70 : f32 to vector<16x64xf32>
    %194 = arith.mulf %193, %192 : vector<16x64xf32>
    %195 = math.tanh %194 : vector<16x64xf32>
    %cst_71 = arith.constant 1.000000e+00 : f32
    %196 = vector.broadcast %cst_71 : f32 to vector<16x64xf32>
    %197 = arith.addf %196, %195 : vector<16x64xf32>
    %cst_72 = arith.constant 5.000000e-01 : f32
    %198 = vector.broadcast %cst_72 : f32 to vector<16x64xf32>
    %199 = arith.mulf %198, %197 : vector<16x64xf32>
    %200 = arith.mulf %187, %199 : vector<16x64xf32>
    %c0_73 = arith.constant 0 : index
    %c0_74 = arith.constant 0 : index
    %c0_75 = arith.constant 0 : index
    %201 = vector.load %arg13[%c0_73, %c0_74, %c0_75] : memref<2x64x32xf32, #tpu.memory_space<vmem>>, vector<1x64x32xf32>
    %202 = vector.shape_cast %201 : vector<1x64x32xf32> to vector<64x32xf32>
    %203 = arith.truncf %200 : vector<16x64xf32> to vector<16x64xbf16>
    %204 = arith.truncf %202 : vector<64x32xf32> to vector<64x32xbf16>
    %cst_76 = arith.constant dense<0.000000e+00> : vector<16x32xf32>
    %205 = tpu.matmul %203, %204, %cst_76 {dimension_numbers = #tpu.dot_dimension_numbers<[1], [0], [0], [1], [0, 0, 1, 1], [], []>} : vector<16x64xbf16>, vector<64x32xbf16>, vector<16x32xf32> -> vector<16x32xf32>
    %c0_77 = arith.constant 0 : index
    %c0_78 = arith.constant 0 : index
    %c0_79 = arith.constant 0 : index
    %206 = vector.load %arg14[%c0_77, %c0_78, %c0_79] : memref<2x1x32xf32, #tpu.memory_space<vmem>>, vector<1x1x32xf32>
    %207 = vector.shape_cast %206 : vector<1x1x32xf32> to vector<1x32xf32>
    %208 = vector.broadcast %207 : vector<1x32xf32> to vector<16x32xf32>
    %209 = arith.addf %205, %208 : vector<16x32xf32>
    %210 = arith.addf %209, %178 : vector<16x32xf32>
    %c0_80 = arith.constant 0 : index
    %c0_81 = arith.constant 0 : index
    %c0_82 = arith.constant 0 : index
    %211 = vector.load %arg15[%c0_80, %c0_81, %c0_82] : memref<2x1x32xf32, #tpu.memory_space<vmem>>, vector<1x1x32xf32>
    %212 = vector.shape_cast %211 : vector<1x1x32xf32> to vector<1x32xf32>
    %c0_83 = arith.constant 0 : index
    %c0_84 = arith.constant 0 : index
    %c0_85 = arith.constant 0 : index
    %213 = vector.load %arg16[%c0_83, %c0_84, %c0_85] : memref<2x1x32xf32, #tpu.memory_space<vmem>>, vector<1x1x32xf32>
    %214 = vector.shape_cast %213 : vector<1x1x32xf32> to vector<1x32xf32>
    %cst_86 = arith.constant dense<0.000000e+00> : vector<16xf32>
    %215 = vector.multi_reduction <add>, %210, %cst_86 [1] : vector<16x32xf32> to vector<16xf32>
    %216 = vector.shape_cast %215 : vector<16xf32> to vector<16x1xf32>
    %cst_87 = arith.constant 3.200000e+01 : f32
    %217 = vector.broadcast %cst_87 : f32 to vector<16x1xf32>
    %218 = arith.divf %216, %217 : vector<16x1xf32>
    %219 = vector.broadcast %218 : vector<16x1xf32> to vector<16x32xf32>
    %220 = arith.subf %210, %219 : vector<16x32xf32>
    %221 = arith.mulf %220, %220 : vector<16x32xf32>
    %cst_88 = arith.constant dense<0.000000e+00> : vector<16xf32>
    %222 = vector.multi_reduction <add>, %221, %cst_88 [1] : vector<16x32xf32> to vector<16xf32>
    %223 = vector.shape_cast %222 : vector<16xf32> to vector<16x1xf32>
    %cst_89 = arith.constant 3.200000e+01 : f32
    %224 = vector.broadcast %cst_89 : f32 to vector<16x1xf32>
    %225 = arith.divf %223, %224 : vector<16x1xf32>
    %226 = vector.broadcast %218 : vector<16x1xf32> to vector<16x32xf32>
    %227 = arith.subf %210, %226 : vector<16x32xf32>
    %cst_90 = arith.constant 9.99999996E-13 : f32
    %228 = vector.broadcast %cst_90 : f32 to vector<16x1xf32>
    %229 = arith.addf %225, %228 : vector<16x1xf32>
    %230 = math.rsqrt %229 : vector<16x1xf32>
    %231 = vector.broadcast %230 : vector<16x1xf32> to vector<16x32xf32>
    %232 = arith.mulf %227, %231 : vector<16x32xf32>
    %233 = vector.broadcast %212 : vector<1x32xf32> to vector<16x32xf32>
    %234 = arith.mulf %232, %233 : vector<16x32xf32>
    %235 = vector.broadcast %214 : vector<1x32xf32> to vector<16x32xf32>
    %236 = arith.addf %234, %235 : vector<16x32xf32>
    %c1 = arith.constant 1 : index
    %c0_91 = arith.constant 0 : index
    %c0_92 = arith.constant 0 : index
    %237 = vector.load %arg5[%c1, %c0_91, %c0_92] : memref<2x32x96xf32, #tpu.memory_space<vmem>>, vector<1x32x96xf32>
    %238 = vector.shape_cast %237 : vector<1x32x96xf32> to vector<32x96xf32>
    %239 = arith.truncf %236 : vector<16x32xf32> to vector<16x32xbf16>
    %240 = arith.truncf %238 : vector<32x96xf32> to vector<32x96xbf16>
    %cst_93 = arith.constant dense<0.000000e+00> : vector<16x96xf32>
    %241 = tpu.matmul %239, %240, %cst_93 {dimension_numbers = #tpu.dot_dimension_numbers<[1], [0], [0], [1], [0, 0, 1, 1], [], []>} : vector<16x32xbf16>, vector<32x96xbf16>, vector<16x96xf32> -> vector<16x96xf32>
    %c1_94 = arith.constant 1 : index
    %c0_95 = arith.constant 0 : index
    %c0_96 = arith.constant 0 : index
    %242 = vector.load %arg6[%c1_94, %c0_95, %c0_96] : memref<2x1x96xf32, #tpu.memory_space<vmem>>, vector<1x1x96xf32>
    %243 = vector.shape_cast %242 : vector<1x1x96xf32> to vector<1x96xf32>
    %244 = vector.broadcast %243 : vector<1x96xf32> to vector<16x96xf32>
    %245 = arith.addf %241, %244 : vector<16x96xf32>
    %c1_97 = arith.constant 1 : index
    %c0_98 = arith.constant 0 : index
    %c0_99 = arith.constant 0 : index
    %246 = vector.load %arg7[%c1_97, %c0_98, %c0_99] : memref<2x32x32xf32, #tpu.memory_space<vmem>>, vector<1x32x32xf32>
    %247 = vector.shape_cast %246 : vector<1x32x32xf32> to vector<32x32xf32>
    %cst_100 = arith.constant 0.000000e+00 : f32
    %248 = vector.broadcast %cst_100 : f32 to vector<16x32xf32>
    %249 = vector.extract_strided_slice %245 {offsets = [0, 0], sizes = [16, 8], strides = [1, 1]} : vector<16x96xf32> to vector<16x8xf32>
    %250 = vector.extract_strided_slice %245 {offsets = [0, 32], sizes = [16, 8], strides = [1, 1]} : vector<16x96xf32> to vector<16x8xf32>
    %251 = vector.extract_strided_slice %245 {offsets = [0, 64], sizes = [16, 8], strides = [1, 1]} : vector<16x96xf32> to vector<16x8xf32>
    %252 = arith.truncf %249 : vector<16x8xf32> to vector<16x8xbf16>
    %253 = arith.truncf %250 : vector<16x8xf32> to vector<16x8xbf16>
    "tpu.trace_start"() <{level = 10 : i32, message = "qd,kd->qk"}> : () -> ()
    %cst_101 = arith.constant dense<0.000000e+00> : vector<16x16xf32>
    %254 = tpu.matmul %252, %253, %cst_101 {dimension_numbers = #tpu.dot_dimension_numbers<[1], [1], [0], [0], [0, 0, 1, 0], [], []>} : vector<16x8xbf16>, vector<16x8xbf16>, vector<16x16xf32> -> vector<16x16xf32>
    "tpu.trace_stop"() : () -> ()
    %cst_102 = arith.constant 0.353553385 : f32
    %255 = vector.broadcast %cst_102 : f32 to vector<16x16xf32>
    %256 = arith.mulf %254, %255 : vector<16x16xf32>
    %257 = arith.addf %256, %27 : vector<16x16xf32>
    %cst_103 = arith.constant dense<0xFF800000> : vector<16xf32>
    %258 = vector.multi_reduction <maximumf>, %257, %cst_103 [1] : vector<16x16xf32> to vector<16xf32>
    %259 = vector.shape_cast %258 : vector<16xf32> to vector<16x1xf32>
    %260 = vector.broadcast %259 : vector<16x1xf32> to vector<16x16xf32>
    %261 = arith.subf %257, %260 : vector<16x16xf32>
    %262 = math.exp %261 : vector<16x16xf32>
    %cst_104 = arith.constant dense<0.000000e+00> : vector<16xf32>
    %263 = vector.multi_reduction <add>, %262, %cst_104 [1] : vector<16x16xf32> to vector<16xf32>
    %264 = vector.shape_cast %263 : vector<16xf32> to vector<16x1xf32>
    %265 = tpu.reciprocal %264 {approx = true} : vector<16x1xf32> -> vector<16x1xf32>
    %266 = vector.broadcast %265 : vector<16x1xf32> to vector<16x16xf32>
    %267 = arith.mulf %262, %266 : vector<16x16xf32>
    %268 = arith.truncf %267 : vector<16x16xf32> to vector<16x16xbf16>
    %269 = arith.truncf %251 : vector<16x8xf32> to vector<16x8xbf16>
    %cst_105 = arith.constant dense<0.000000e+00> : vector<16x8xf32>
    %270 = tpu.matmul %268, %269, %cst_105 {dimension_numbers = #tpu.dot_dimension_numbers<[1], [0], [0], [1], [0, 0, 1, 1], [], []>} : vector<16x16xbf16>, vector<16x8xbf16>, vector<16x8xf32> -> vector<16x8xf32>
    %271 = vector.extract_strided_slice %247 {offsets = [0, 0], sizes = [8, 32], strides = [1, 1]} : vector<32x32xf32> to vector<8x32xf32>
    %272 = arith.truncf %270 : vector<16x8xf32> to vector<16x8xbf16>
    %273 = arith.truncf %271 : vector<8x32xf32> to vector<8x32xbf16>
    %cst_106 = arith.constant dense<0.000000e+00> : vector<16x32xf32>
    %274 = tpu.matmul %272, %273, %cst_106 {dimension_numbers = #tpu.dot_dimension_numbers<[1], [0], [0], [1], [0, 0, 1, 1], [], []>} : vector<16x8xbf16>, vector<8x32xbf16>, vector<16x32xf32> -> vector<16x32xf32>
    %275 = arith.addf %248, %274 : vector<16x32xf32>
    %276 = vector.extract_strided_slice %245 {offsets = [0, 8], sizes = [16, 8], strides = [1, 1]} : vector<16x96xf32> to vector<16x8xf32>
    %277 = vector.extract_strided_slice %245 {offsets = [0, 40], sizes = [16, 8], strides = [1, 1]} : vector<16x96xf32> to vector<16x8xf32>
    %278 = vector.extract_strided_slice %245 {offsets = [0, 72], sizes = [16, 8], strides = [1, 1]} : vector<16x96xf32> to vector<16x8xf32>
    %279 = arith.truncf %276 : vector<16x8xf32> to vector<16x8xbf16>
    %280 = arith.truncf %277 : vector<16x8xf32> to vector<16x8xbf16>
    "tpu.trace_start"() <{level = 10 : i32, message = "qd,kd->qk"}> : () -> ()
    %cst_107 = arith.constant dense<0.000000e+00> : vector<16x16xf32>
    %281 = tpu.matmul %279, %280, %cst_107 {dimension_numbers = #tpu.dot_dimension_numbers<[1], [1], [0], [0], [0, 0, 1, 0], [], []>} : vector<16x8xbf16>, vector<16x8xbf16>, vector<16x16xf32> -> vector<16x16xf32>
    "tpu.trace_stop"() : () -> ()
    %cst_108 = arith.constant 0.353553385 : f32
    %282 = vector.broadcast %cst_108 : f32 to vector<16x16xf32>
    %283 = arith.mulf %281, %282 : vector<16x16xf32>
    %284 = arith.addf %283, %27 : vector<16x16xf32>
    %cst_109 = arith.constant dense<0xFF800000> : vector<16xf32>
    %285 = vector.multi_reduction <maximumf>, %284, %cst_109 [1] : vector<16x16xf32> to vector<16xf32>
    %286 = vector.shape_cast %285 : vector<16xf32> to vector<16x1xf32>
    %287 = vector.broadcast %286 : vector<16x1xf32> to vector<16x16xf32>
    %288 = arith.subf %284, %287 : vector<16x16xf32>
    %289 = math.exp %288 : vector<16x16xf32>
    %cst_110 = arith.constant dense<0.000000e+00> : vector<16xf32>
    %290 = vector.multi_reduction <add>, %289, %cst_110 [1] : vector<16x16xf32> to vector<16xf32>
    %291 = vector.shape_cast %290 : vector<16xf32> to vector<16x1xf32>
    %292 = tpu.reciprocal %291 {approx = true} : vector<16x1xf32> -> vector<16x1xf32>
    %293 = vector.broadcast %292 : vector<16x1xf32> to vector<16x16xf32>
    %294 = arith.mulf %289, %293 : vector<16x16xf32>
    %295 = arith.truncf %294 : vector<16x16xf32> to vector<16x16xbf16>
    %296 = arith.truncf %278 : vector<16x8xf32> to vector<16x8xbf16>
    %cst_111 = arith.constant dense<0.000000e+00> : vector<16x8xf32>
    %297 = tpu.matmul %295, %296, %cst_111 {dimension_numbers = #tpu.dot_dimension_numbers<[1], [0], [0], [1], [0, 0, 1, 1], [], []>} : vector<16x16xbf16>, vector<16x8xbf16>, vector<16x8xf32> -> vector<16x8xf32>
    %298 = vector.extract_strided_slice %247 {offsets = [8, 0], sizes = [8, 32], strides = [1, 1]} : vector<32x32xf32> to vector<8x32xf32>
    %299 = arith.truncf %297 : vector<16x8xf32> to vector<16x8xbf16>
    %300 = arith.truncf %298 : vector<8x32xf32> to vector<8x32xbf16>
    %cst_112 = arith.constant dense<0.000000e+00> : vector<16x32xf32>
    %301 = tpu.matmul %299, %300, %cst_112 {dimension_numbers = #tpu.dot_dimension_numbers<[1], [0], [0], [1], [0, 0, 1, 1], [], []>} : vector<16x8xbf16>, vector<8x32xbf16>, vector<16x32xf32> -> vector<16x32xf32>
    %302 = arith.addf %275, %301 : vector<16x32xf32>
    %303 = vector.extract_strided_slice %245 {offsets = [0, 16], sizes = [16, 8], strides = [1, 1]} : vector<16x96xf32> to vector<16x8xf32>
    %304 = vector.extract_strided_slice %245 {offsets = [0, 48], sizes = [16, 8], strides = [1, 1]} : vector<16x96xf32> to vector<16x8xf32>
    %305 = vector.extract_strided_slice %245 {offsets = [0, 80], sizes = [16, 8], strides = [1, 1]} : vector<16x96xf32> to vector<16x8xf32>
    %306 = arith.truncf %303 : vector<16x8xf32> to vector<16x8xbf16>
    %307 = arith.truncf %304 : vector<16x8xf32> to vector<16x8xbf16>
    "tpu.trace_start"() <{level = 10 : i32, message = "qd,kd->qk"}> : () -> ()
    %cst_113 = arith.constant dense<0.000000e+00> : vector<16x16xf32>
    %308 = tpu.matmul %306, %307, %cst_113 {dimension_numbers = #tpu.dot_dimension_numbers<[1], [1], [0], [0], [0, 0, 1, 0], [], []>} : vector<16x8xbf16>, vector<16x8xbf16>, vector<16x16xf32> -> vector<16x16xf32>
    "tpu.trace_stop"() : () -> ()
    %cst_114 = arith.constant 0.353553385 : f32
    %309 = vector.broadcast %cst_114 : f32 to vector<16x16xf32>
    %310 = arith.mulf %308, %309 : vector<16x16xf32>
    %311 = arith.addf %310, %27 : vector<16x16xf32>
    %cst_115 = arith.constant dense<0xFF800000> : vector<16xf32>
    %312 = vector.multi_reduction <maximumf>, %311, %cst_115 [1] : vector<16x16xf32> to vector<16xf32>
    %313 = vector.shape_cast %312 : vector<16xf32> to vector<16x1xf32>
    %314 = vector.broadcast %313 : vector<16x1xf32> to vector<16x16xf32>
    %315 = arith.subf %311, %314 : vector<16x16xf32>
    %316 = math.exp %315 : vector<16x16xf32>
    %cst_116 = arith.constant dense<0.000000e+00> : vector<16xf32>
    %317 = vector.multi_reduction <add>, %316, %cst_116 [1] : vector<16x16xf32> to vector<16xf32>
    %318 = vector.shape_cast %317 : vector<16xf32> to vector<16x1xf32>
    %319 = tpu.reciprocal %318 {approx = true} : vector<16x1xf32> -> vector<16x1xf32>
    %320 = vector.broadcast %319 : vector<16x1xf32> to vector<16x16xf32>
    %321 = arith.mulf %316, %320 : vector<16x16xf32>
    %322 = arith.truncf %321 : vector<16x16xf32> to vector<16x16xbf16>
    %323 = arith.truncf %305 : vector<16x8xf32> to vector<16x8xbf16>
    %cst_117 = arith.constant dense<0.000000e+00> : vector<16x8xf32>
    %324 = tpu.matmul %322, %323, %cst_117 {dimension_numbers = #tpu.dot_dimension_numbers<[1], [0], [0], [1], [0, 0, 1, 1], [], []>} : vector<16x16xbf16>, vector<16x8xbf16>, vector<16x8xf32> -> vector<16x8xf32>
    %325 = vector.extract_strided_slice %247 {offsets = [16, 0], sizes = [8, 32], strides = [1, 1]} : vector<32x32xf32> to vector<8x32xf32>
    %326 = arith.truncf %324 : vector<16x8xf32> to vector<16x8xbf16>
    %327 = arith.truncf %325 : vector<8x32xf32> to vector<8x32xbf16>
    %cst_118 = arith.constant dense<0.000000e+00> : vector<16x32xf32>
    %328 = tpu.matmul %326, %327, %cst_118 {dimension_numbers = #tpu.dot_dimension_numbers<[1], [0], [0], [1], [0, 0, 1, 1], [], []>} : vector<16x8xbf16>, vector<8x32xbf16>, vector<16x32xf32> -> vector<16x32xf32>
    %329 = arith.addf %302, %328 : vector<16x32xf32>
    %330 = vector.extract_strided_slice %245 {offsets = [0, 24], sizes = [16, 8], strides = [1, 1]} : vector<16x96xf32> to vector<16x8xf32>
    %331 = vector.extract_strided_slice %245 {offsets = [0, 56], sizes = [16, 8], strides = [1, 1]} : vector<16x96xf32> to vector<16x8xf32>
    %332 = vector.extract_strided_slice %245 {offsets = [0, 88], sizes = [16, 8], strides = [1, 1]} : vector<16x96xf32> to vector<16x8xf32>
    %333 = arith.truncf %330 : vector<16x8xf32> to vector<16x8xbf16>
    %334 = arith.truncf %331 : vector<16x8xf32> to vector<16x8xbf16>
    "tpu.trace_start"() <{level = 10 : i32, message = "qd,kd->qk"}> : () -> ()
    %cst_119 = arith.constant dense<0.000000e+00> : vector<16x16xf32>
    %335 = tpu.matmul %333, %334, %cst_119 {dimension_numbers = #tpu.dot_dimension_numbers<[1], [1], [0], [0], [0, 0, 1, 0], [], []>} : vector<16x8xbf16>, vector<16x8xbf16>, vector<16x16xf32> -> vector<16x16xf32>
    "tpu.trace_stop"() : () -> ()
    %cst_120 = arith.constant 0.353553385 : f32
    %336 = vector.broadcast %cst_120 : f32 to vector<16x16xf32>
    %337 = arith.mulf %335, %336 : vector<16x16xf32>
    %338 = arith.addf %337, %27 : vector<16x16xf32>
    %cst_121 = arith.constant dense<0xFF800000> : vector<16xf32>
    %339 = vector.multi_reduction <maximumf>, %338, %cst_121 [1] : vector<16x16xf32> to vector<16xf32>
    %340 = vector.shape_cast %339 : vector<16xf32> to vector<16x1xf32>
    %341 = vector.broadcast %340 : vector<16x1xf32> to vector<16x16xf32>
    %342 = arith.subf %338, %341 : vector<16x16xf32>
    %343 = math.exp %342 : vector<16x16xf32>
    %cst_122 = arith.constant dense<0.000000e+00> : vector<16xf32>
    %344 = vector.multi_reduction <add>, %343, %cst_122 [1] : vector<16x16xf32> to vector<16xf32>
    %345 = vector.shape_cast %344 : vector<16xf32> to vector<16x1xf32>
    %346 = tpu.reciprocal %345 {approx = true} : vector<16x1xf32> -> vector<16x1xf32>
    %347 = vector.broadcast %346 : vector<16x1xf32> to vector<16x16xf32>
    %348 = arith.mulf %343, %347 : vector<16x16xf32>
    %349 = arith.truncf %348 : vector<16x16xf32> to vector<16x16xbf16>
    %350 = arith.truncf %332 : vector<16x8xf32> to vector<16x8xbf16>
    %cst_123 = arith.constant dense<0.000000e+00> : vector<16x8xf32>
    %351 = tpu.matmul %349, %350, %cst_123 {dimension_numbers = #tpu.dot_dimension_numbers<[1], [0], [0], [1], [0, 0, 1, 1], [], []>} : vector<16x16xbf16>, vector<16x8xbf16>, vector<16x8xf32> -> vector<16x8xf32>
    %352 = vector.extract_strided_slice %247 {offsets = [24, 0], sizes = [8, 32], strides = [1, 1]} : vector<32x32xf32> to vector<8x32xf32>
    %353 = arith.truncf %351 : vector<16x8xf32> to vector<16x8xbf16>
    %354 = arith.truncf %352 : vector<8x32xf32> to vector<8x32xbf16>
    %cst_124 = arith.constant dense<0.000000e+00> : vector<16x32xf32>
    %355 = tpu.matmul %353, %354, %cst_124 {dimension_numbers = #tpu.dot_dimension_numbers<[1], [0], [0], [1], [0, 0, 1, 1], [], []>} : vector<16x8xbf16>, vector<8x32xbf16>, vector<16x32xf32> -> vector<16x32xf32>
    %356 = arith.addf %329, %355 : vector<16x32xf32>
    %c1_125 = arith.constant 1 : index
    %c0_126 = arith.constant 0 : index
    %c0_127 = arith.constant 0 : index
    %357 = vector.load %arg8[%c1_125, %c0_126, %c0_127] : memref<2x1x32xf32, #tpu.memory_space<vmem>>, vector<1x1x32xf32>
    %358 = vector.shape_cast %357 : vector<1x1x32xf32> to vector<1x32xf32>
    %359 = vector.broadcast %358 : vector<1x32xf32> to vector<16x32xf32>
    %360 = arith.addf %356, %359 : vector<16x32xf32>
    %361 = arith.addf %360, %236 : vector<16x32xf32>
    %c1_128 = arith.constant 1 : index
    %c0_129 = arith.constant 0 : index
    %c0_130 = arith.constant 0 : index
    %362 = vector.load %arg9[%c1_128, %c0_129, %c0_130] : memref<2x1x32xf32, #tpu.memory_space<vmem>>, vector<1x1x32xf32>
    %363 = vector.shape_cast %362 : vector<1x1x32xf32> to vector<1x32xf32>
    %c1_131 = arith.constant 1 : index
    %c0_132 = arith.constant 0 : index
    %c0_133 = arith.constant 0 : index
    %364 = vector.load %arg10[%c1_131, %c0_132, %c0_133] : memref<2x1x32xf32, #tpu.memory_space<vmem>>, vector<1x1x32xf32>
    %365 = vector.shape_cast %364 : vector<1x1x32xf32> to vector<1x32xf32>
    %cst_134 = arith.constant dense<0.000000e+00> : vector<16xf32>
    %366 = vector.multi_reduction <add>, %361, %cst_134 [1] : vector<16x32xf32> to vector<16xf32>
    %367 = vector.shape_cast %366 : vector<16xf32> to vector<16x1xf32>
    %cst_135 = arith.constant 3.200000e+01 : f32
    %368 = vector.broadcast %cst_135 : f32 to vector<16x1xf32>
    %369 = arith.divf %367, %368 : vector<16x1xf32>
    %370 = vector.broadcast %369 : vector<16x1xf32> to vector<16x32xf32>
    %371 = arith.subf %361, %370 : vector<16x32xf32>
    %372 = arith.mulf %371, %371 : vector<16x32xf32>
    %cst_136 = arith.constant dense<0.000000e+00> : vector<16xf32>
    %373 = vector.multi_reduction <add>, %372, %cst_136 [1] : vector<16x32xf32> to vector<16xf32>
    %374 = vector.shape_cast %373 : vector<16xf32> to vector<16x1xf32>
    %cst_137 = arith.constant 3.200000e+01 : f32
    %375 = vector.broadcast %cst_137 : f32 to vector<16x1xf32>
    %376 = arith.divf %374, %375 : vector<16x1xf32>
    %377 = vector.broadcast %369 : vector<16x1xf32> to vector<16x32xf32>
    %378 = arith.subf %361, %377 : vector<16x32xf32>
    %cst_138 = arith.constant 9.99999996E-13 : f32
    %379 = vector.broadcast %cst_138 : f32 to vector<16x1xf32>
    %380 = arith.addf %376, %379 : vector<16x1xf32>
    %381 = math.rsqrt %380 : vector<16x1xf32>
    %382 = vector.broadcast %381 : vector<16x1xf32> to vector<16x32xf32>
    %383 = arith.mulf %378, %382 : vector<16x32xf32>
    %384 = vector.broadcast %363 : vector<1x32xf32> to vector<16x32xf32>
    %385 = arith.mulf %383, %384 : vector<16x32xf32>
    %386 = vector.broadcast %365 : vector<1x32xf32> to vector<16x32xf32>
    %387 = arith.addf %385, %386 : vector<16x32xf32>
    %c1_139 = arith.constant 1 : index
    %c0_140 = arith.constant 0 : index
    %c0_141 = arith.constant 0 : index
    %388 = vector.load %arg11[%c1_139, %c0_140, %c0_141] : memref<2x32x64xf32, #tpu.memory_space<vmem>>, vector<1x32x64xf32>
    %389 = vector.shape_cast %388 : vector<1x32x64xf32> to vector<32x64xf32>
    %390 = arith.truncf %387 : vector<16x32xf32> to vector<16x32xbf16>
    %391 = arith.truncf %389 : vector<32x64xf32> to vector<32x64xbf16>
    %cst_142 = arith.constant dense<0.000000e+00> : vector<16x64xf32>
    %392 = tpu.matmul %390, %391, %cst_142 {dimension_numbers = #tpu.dot_dimension_numbers<[1], [0], [0], [1], [0, 0, 1, 1], [], []>} : vector<16x32xbf16>, vector<32x64xbf16>, vector<16x64xf32> -> vector<16x64xf32>
    %c1_143 = arith.constant 1 : index
    %c0_144 = arith.constant 0 : index
    %c0_145 = arith.constant 0 : index
    %393 = vector.load %arg12[%c1_143, %c0_144, %c0_145] : memref<2x1x64xf32, #tpu.memory_space<vmem>>, vector<1x1x64xf32>
    %394 = vector.shape_cast %393 : vector<1x1x64xf32> to vector<1x64xf32>
    %395 = vector.broadcast %394 : vector<1x64xf32> to vector<16x64xf32>
    %396 = arith.addf %392, %395 : vector<16x64xf32>
    %397 = arith.mulf %396, %396 : vector<16x64xf32>
    %398 = arith.mulf %396, %397 : vector<16x64xf32>
    %cst_146 = arith.constant 4.471500e-02 : f32
    %399 = vector.broadcast %cst_146 : f32 to vector<16x64xf32>
    %400 = arith.mulf %399, %398 : vector<16x64xf32>
    %401 = arith.addf %396, %400 : vector<16x64xf32>
    %cst_147 = arith.constant 0.797884583 : f32
    %402 = vector.broadcast %cst_147 : f32 to vector<16x64xf32>
    %403 = arith.mulf %402, %401 : vector<16x64xf32>
    %404 = math.tanh %403 : vector<16x64xf32>
    %cst_148 = arith.constant 1.000000e+00 : f32
    %405 = vector.broadcast %cst_148 : f32 to vector<16x64xf32>
    %406 = arith.addf %405, %404 : vector<16x64xf32>
    %cst_149 = arith.constant 5.000000e-01 : f32
    %407 = vector.broadcast %cst_149 : f32 to vector<16x64xf32>
    %408 = arith.mulf %407, %406 : vector<16x64xf32>
    %409 = arith.mulf %396, %408 : vector<16x64xf32>
    %c1_150 = arith.constant 1 : index
    %c0_151 = arith.constant 0 : index
    %c0_152 = arith.constant 0 : index
    %410 = vector.load %arg13[%c1_150, %c0_151, %c0_152] : memref<2x64x32xf32, #tpu.memory_space<vmem>>, vector<1x64x32xf32>
    %411 = vector.shape_cast %410 : vector<1x64x32xf32> to vector<64x32xf32>
    %412 = arith.truncf %409 : vector<16x64xf32> to vector<16x64xbf16>
    %413 = arith.truncf %411 : vector<64x32xf32> to vector<64x32xbf16>
    %cst_153 = arith.constant dense<0.000000e+00> : vector<16x32xf32>
    %414 = tpu.matmul %412, %413, %cst_153 {dimension_numbers = #tpu.dot_dimension_numbers<[1], [0], [0], [1], [0, 0, 1, 1], [], []>} : vector<16x64xbf16>, vector<64x32xbf16>, vector<16x32xf32> -> vector<16x32xf32>
    %c1_154 = arith.constant 1 : index
    %c0_155 = arith.constant 0 : index
    %c0_156 = arith.constant 0 : index
    %415 = vector.load %arg14[%c1_154, %c0_155, %c0_156] : memref<2x1x32xf32, #tpu.memory_space<vmem>>, vector<1x1x32xf32>
    %416 = vector.shape_cast %415 : vector<1x1x32xf32> to vector<1x32xf32>
    %417 = vector.broadcast %416 : vector<1x32xf32> to vector<16x32xf32>
    %418 = arith.addf %414, %417 : vector<16x32xf32>
    %419 = arith.addf %418, %387 : vector<16x32xf32>
    %c1_157 = arith.constant 1 : index
    %c0_158 = arith.constant 0 : index
    %c0_159 = arith.constant 0 : index
    %420 = vector.load %arg15[%c1_157, %c0_158, %c0_159] : memref<2x1x32xf32, #tpu.memory_space<vmem>>, vector<1x1x32xf32>
    %421 = vector.shape_cast %420 : vector<1x1x32xf32> to vector<1x32xf32>
    %c1_160 = arith.constant 1 : index
    %c0_161 = arith.constant 0 : index
    %c0_162 = arith.constant 0 : index
    %422 = vector.load %arg16[%c1_160, %c0_161, %c0_162] : memref<2x1x32xf32, #tpu.memory_space<vmem>>, vector<1x1x32xf32>
    %423 = vector.shape_cast %422 : vector<1x1x32xf32> to vector<1x32xf32>
    %cst_163 = arith.constant dense<0.000000e+00> : vector<16xf32>
    %424 = vector.multi_reduction <add>, %419, %cst_163 [1] : vector<16x32xf32> to vector<16xf32>
    %425 = vector.shape_cast %424 : vector<16xf32> to vector<16x1xf32>
    %cst_164 = arith.constant 3.200000e+01 : f32
    %426 = vector.broadcast %cst_164 : f32 to vector<16x1xf32>
    %427 = arith.divf %425, %426 : vector<16x1xf32>
    %428 = vector.broadcast %427 : vector<16x1xf32> to vector<16x32xf32>
    %429 = arith.subf %419, %428 : vector<16x32xf32>
    %430 = arith.mulf %429, %429 : vector<16x32xf32>
    %cst_165 = arith.constant dense<0.000000e+00> : vector<16xf32>
    %431 = vector.multi_reduction <add>, %430, %cst_165 [1] : vector<16x32xf32> to vector<16xf32>
    %432 = vector.shape_cast %431 : vector<16xf32> to vector<16x1xf32>
    %cst_166 = arith.constant 3.200000e+01 : f32
    %433 = vector.broadcast %cst_166 : f32 to vector<16x1xf32>
    %434 = arith.divf %432, %433 : vector<16x1xf32>
    %435 = vector.broadcast %427 : vector<16x1xf32> to vector<16x32xf32>
    %436 = arith.subf %419, %435 : vector<16x32xf32>
    %cst_167 = arith.constant 9.99999996E-13 : f32
    %437 = vector.broadcast %cst_167 : f32 to vector<16x1xf32>
    %438 = arith.addf %434, %437 : vector<16x1xf32>
    %439 = math.rsqrt %438 : vector<16x1xf32>
    %440 = vector.broadcast %439 : vector<16x1xf32> to vector<16x32xf32>
    %441 = arith.mulf %436, %440 : vector<16x32xf32>
    %442 = vector.broadcast %421 : vector<1x32xf32> to vector<16x32xf32>
    %443 = arith.mulf %441, %442 : vector<16x32xf32>
    %444 = vector.broadcast %423 : vector<1x32xf32> to vector<16x32xf32>
    %445 = arith.addf %443, %444 : vector<16x32xf32>
    %c0_168 = arith.constant 0 : index
    %c0_169 = arith.constant 0 : index
    %446 = vector.load %arg22[%c0_168, %c0_169] : memref<16x32xf32, #tpu.memory_space<vmem>>, vector<16x32xf32>
    tpu.vector_store %arg22[%c0_168, %c0_169], %445 {strides = array<i32>} : memref<16x32xf32, #tpu.memory_space<vmem>>, vector<16x32xf32>,
    %447 = tpu.iota {dimensions = array<i32: 0>} : vector<2x16xi32>
    %448 = tpu.iota {dimensions = array<i32: 1>} : vector<2x16xi32>
    %c8_i32 = arith.constant 8 : i32
    %449 = vector.broadcast %c8_i32 : i32 to vector<2x16xi32>
    %450 = arith.muli %447, %449 : vector<2x16xi32>
    %451 = arith.cmpi eq, %448, %450 : vector<2x16xi32>
    %452 = arith.extui %451 : vector<2x16xi1> to vector<2x16xi32>
    %453 = arith.sitofp %452 : vector<2x16xi32> to vector<2x16xf32>
    %454 = arith.truncf %453 : vector<2x16xf32> to vector<2x16xbf16>
    %455 = arith.truncf %445 : vector<16x32xf32> to vector<16x32xbf16>
    %cst_170 = arith.constant dense<0.000000e+00> : vector<2x32xf32>
    %456 = tpu.matmul %454, %455, %cst_170 {dimension_numbers = #tpu.dot_dimension_numbers<[1], [0], [0], [1], [0, 0, 1, 1], [], []>} : vector<2x16xbf16>, vector<16x32xbf16>, vector<2x32xf32> -> vector<2x32xf32>
    %c0_171 = arith.constant 0 : index
    %c0_172 = arith.constant 0 : index
    %457 = vector.load %arg17[%c0_171, %c0_172] : memref<32x32xf32, #tpu.memory_space<vmem>>, vector<32x32xf32>
    %458 = arith.truncf %456 : vector<2x32xf32> to vector<2x32xbf16>
    %459 = arith.truncf %457 : vector<32x32xf32> to vector<32x32xbf16>
    %cst_173 = arith.constant dense<0.000000e+00> : vector<2x32xf32>
    %460 = tpu.matmul %458, %459, %cst_173 {dimension_numbers = #tpu.dot_dimension_numbers<[1], [0], [0], [1], [0, 0, 1, 1], [], []>} : vector<2x32xbf16>, vector<32x32xbf16>, vector<2x32xf32> -> vector<2x32xf32>
    %c0_174 = arith.constant 0 : index
    %c0_175 = arith.constant 0 : index
    %461 = vector.load %arg18[%c0_174, %c0_175] : memref<1x32xf32, #tpu.memory_space<vmem>>, vector<1x32xf32>
    %462 = vector.broadcast %461 : vector<1x32xf32> to vector<2x32xf32>
    %463 = arith.addf %460, %462 : vector<2x32xf32>
    %464 = math.tanh %463 : vector<2x32xf32>
    %c0_176 = arith.constant 0 : index
    %c0_177 = arith.constant 0 : index
    %465 = vector.load %arg19[%c0_176, %c0_177] : memref<32x3xf32, #tpu.memory_space<vmem>>, vector<32x3xf32>
    %466 = arith.truncf %464 : vector<2x32xf32> to vector<2x32xbf16>
    %467 = arith.truncf %465 : vector<32x3xf32> to vector<32x3xbf16>
    %cst_178 = arith.constant dense<0.000000e+00> : vector<2x3xf32>
    %468 = tpu.matmul %466, %467, %cst_178 {dimension_numbers = #tpu.dot_dimension_numbers<[1], [0], [0], [1], [0, 0, 1, 1], [], []>} : vector<2x32xbf16>, vector<32x3xbf16>, vector<2x3xf32> -> vector<2x3xf32>
    %c0_179 = arith.constant 0 : index
    %c0_180 = arith.constant 0 : index
    %469 = vector.load %arg20[%c0_179, %c0_180] : memref<1x3xf32, #tpu.memory_space<vmem>>, vector<1x3xf32>
    %470 = vector.broadcast %469 : vector<1x3xf32> to vector<2x3xf32>
    %471 = arith.addf %468, %470 : vector<2x3xf32>
    %c0_181 = arith.constant 0 : index
    %c0_182 = arith.constant 0 : index
    %472 = vector.load %arg23[%c0_181, %c0_182] : memref<2x3xf32, #tpu.memory_space<vmem>>, vector<2x3xf32>
    tpu.vector_store %arg23[%c0_181, %c0_182], %471 {strides = array<i32>} : memref<2x3xf32, #tpu.memory_space<vmem>>, vector<2x3xf32>,
    %cst_183 = arith.constant dense<0xFF800000> : vector<2xf32>
    %473 = vector.multi_reduction <maximumf>, %471, %cst_183 [1] : vector<2x3xf32> to vector<2xf32>
    %474 = vector.shape_cast %473 : vector<2xf32> to vector<2x1xf32>
    %475 = vector.broadcast %474 : vector<2x1xf32> to vector<2x3xf32>
    %476 = arith.subf %471, %475 : vector<2x3xf32>
    %477 = math.exp %476 : vector<2x3xf32>
    %cst_184 = arith.constant dense<0.000000e+00> : vector<2xf32>
    %478 = vector.multi_reduction <add>, %477, %cst_184 [1] : vector<2x3xf32> to vector<2xf32>
    %479 = vector.shape_cast %478 : vector<2xf32> to vector<2x1xf32>
    %480 = math.log %479 : vector<2x1xf32>
    %481 = arith.addf %480, %474 : vector<2x1xf32>
    %c0_185 = arith.constant 0 : index
    %c0_186 = arith.constant 0 : index
    %482 = vector.load %arg21[%c0_185, %c0_186] : memref<2x3xf32, #tpu.memory_space<vmem>>, vector<2x3xf32>
    %483 = arith.mulf %471, %482 : vector<2x3xf32>
    %cst_187 = arith.constant dense<0.000000e+00> : vector<2xf32>
    %484 = vector.multi_reduction <add>, %483, %cst_187 [1] : vector<2x3xf32> to vector<2xf32>
    %485 = vector.shape_cast %484 : vector<2xf32> to vector<2x1xf32>
    %486 = arith.subf %481, %485 : vector<2x1xf32>
    %cst_188 = arith.constant dense<0.000000e+00> : vector<1xf32>
    %487 = vector.multi_reduction <add>, %486, %cst_188 [0] : vector<2x1xf32> to vector<1xf32>
    %488 = vector.shape_cast %487 : vector<1xf32> to vector<1x1xf32>
    %cst_189 = arith.constant 2.000000e+00 : f32
    %489 = vector.broadcast %cst_189 : f32 to vector<1x1xf32>
    %490 = arith.divf %488, %489 : vector<1x1xf32>
    %c0_190 = arith.constant 0 : index
    %c0_191 = arith.constant 0 : index
    %491 = vector.load %arg24[%c0_190, %c0_191] : memref<1x1xf32, #tpu.memory_space<vmem>>, vector<1x1xf32>
    tpu.vector_store %arg24[%c0_190, %c0_191], %490 {strides = array<i32>} : memref<1x1xf32, #tpu.memory_space<vmem>>, vector<1x1xf32>,
    return
  }
}

</mosaic_0001>

<bundles_post_ra>
// kernel: tpu_custom_call.1
= control target key start
LH: loop header
LB: loop body
LE: loop exit
PB: predicated region body
PF: predicated region fallthrough
CT: control target
= control target key end

     0   :  { %s3854_s0 = inlined_call_operand.hbm [shape: f32[16,32], index: 0, kind: input, shape index: {}]   ;;  %s3855_s1 = inlined_call_operand.hbm [shape: f32[16,32], index: 1, kind: input, shape index: {}]   ;;  %s3856_s2 = inlined_call_operand.hbm [shape: f32[1,32], index: 2, kind: input, shape index: {}]   ;;  %s3857_s3 = inlined_call_operand.hbm [shape: f32[1,32], index: 3, kind: input, shape index: {}]   ;;  %s3858_s4 = inlined_call_operand.hbm [shape: f32[16,16], index: 4, kind: input, shape index: {}]   ;;  %s3859_s5 = inlined_call_operand.vmem [shape: f32[2,32,96], index: 5, kind: input, shape index: {}]   ;;  %s3860_s6 = inlined_call_operand.vmem [shape: f32[2,1,96], index: 6, kind: input, shape index: {}]   ;;  %s3861_s7 = inlined_call_operand.vmem [shape: f32[2,32,32], index: 7, kind: input, shape index: {}]   ;;  %s3862_s8 = inlined_call_operand.vmem [shape: f32[2,1,32], index: 8, kind: input, shape index: {}]   ;;  %s3863_s9 = inlined_call_operand.vmem [shape: f32[2,1,32], index: 9, kind: input, shape index: {}]   ;;  %s3864_s10 = inlined_call_operand.vmem [shape: f32[2,1,32], index: 10, kind: input, shape index: {}]   ;;  %s3865_s11 = inlined_call_operand.vmem [shape: f32[2,32,64], index: 11, kind: input, shape index: {}]   ;;  %s3866_s12 = inlined_call_operand.vmem [shape: f32[2,1,64], index: 12, kind: input, shape index: {}]   ;;  %s3867_s13 = inlined_call_operand.vmem [shape: f32[2,64,32], index: 13, kind: input, shape index: {}]   ;;  %s3868_s14 = inlined_call_operand.vmem [shape: f32[2,1,32], index: 14, kind: input, shape index: {}]   ;;  %s3869_s15 = inlined_call_operand.vmem [shape: f32[2,1,32], index: 15, kind: input, shape index: {}]   ;;  %s3870_s16 = inlined_call_operand.vmem [shape: f32[2,1,32], index: 16, kind: input, shape index: {}]   ;;  %s3871_s17 = inlined_call_operand.vmem [shape: f32[32,32], index: 17, kind: input, shape index: {}]   ;;  %s3872_s18 = inlined_call_operand.vmem [shape: f32[1,32], index: 18, kind: input, shape index: {}]   ;;  %s3873_s19 = inlined_call_operand.vmem [shape: f32[32,3], index: 19, kind: input, shape index: {}]   ;;  %s3874_s20 = inlined_call_operand.vmem [shape: f32[1,3], index: 20, kind: input, shape index: {}]   ;;  %s3875_s21 = inlined_call_operand.vmem [shape: f32[2,3], index: 21, kind: input, shape index: {}]   ;;  %s3876_s22 = inlined_call_operand.hbm [shape: f32[16,32], index: 22, kind: output, shape index: {0}]   ;;  %s3877_s23 = inlined_call_operand.hbm [shape: f32[2,3], index: 23, kind: output, shape index: {1}]   ;;  %s3878_s24 = inlined_call_operand.hbm [shape: f32[1,1], index: 24, kind: output, shape index: {2}]  }
   0x1   :  { %3892 = sst [smem:[#allocation20_spill]] %s3854_s0 }
   0x2   :  { %3893 = sst [smem:[#allocation21_spill]] %s3855_s1 }
   0x3   :  { %3894 = sst [smem:[#allocation22_spill]] %s3856_s2 }
   0x4   :  { %3895 = sst [smem:[#allocation23_spill]] %s3857_s3 }
   0x5   :  { %3896 = sst [smem:[#allocation24_spill]] %s3858_s4 }
   0x6   :  { %3897 = sst [smem:[#allocation25_spill]] %s3859_s5 }
   0x7   :  { %3898 = sst [smem:[#allocation26_spill]] %s3860_s6 }
   0x8   :  { %3899 = sst [smem:[#allocation27_spill]] %s3861_s7 }
   0x9   :  { %3900 = sst [smem:[#allocation28_spill]] %s3862_s8 }
   0xa   :  { %3901 = sst [smem:[#allocation29_spill]] %s3878_s24 }
   0xb   :  { %30 = vsyncpa [#allocation3], 0 }
   0xc   :  { %31 = vsyncpa [#allocation6], 0 }
   0xd   :  { %32 = vsyncpa [#allocation9], 0 }
   0xe   :  { %33 = vsyncpa [#allocation4], 0 }
   0xf   :  { %34 = vsyncpa [#allocation13], 0  ;;  %s3140_s5 = smov [#allocation5]   ;;  %s3141_s27 = smov [#allocation8]  }
  0x10   :  { %s52_s26 = sshll.u32 %s3140_s5, 4  ;;  %s75_s28 = sshll.u32 %s3141_s27, 4  ;;  %s53_s26 = int_to_ptr.vmem [resolvable:$true] %s52_s26  ;;  %s76_s28 = int_to_ptr.vmem [resolvable:$true] %s75_s28 }
  0x11   :  { %s2978_s6 = scalar_lea.vmem %s53_s26, 256  ;;  %p2983_p1 = scmp.lt.s32.totalorder %s53_s26, %s53_s26 }
  0x12   :  { %p2979_p0 = scmp.ne.s32.totalorder %s53_s26, %s2978_s6  ;;  %p2984_p2 = scmp.lt.s32.totalorder %s2978_s6, %s2978_s6 }
  0x14   :  { %p2985_p3 = por %p2984_p2, %p2983_p1 }
  0x16   :  { %p2986_p4 = pnand %p2985_p3, %p2979_p0 }
  0x18   :  { %2989 = shalt.err (!%p2986_p4)
}
  0x19   :  { %s3883_s2 = smov 128   ;;  %s3884_s29 = smov 8  }
  0x1a   :  { %s3902_s30 = sld [smem:[#allocation21_spill]]  ;;  %s2998_s3 = scalar_lea.vmem %s76_s28, 16 }
  0x1b   :  { %p2999_p5 = scmp.ne.s32.totalorder %s76_s28, %s2998_s3  ;;  %s3002_s25 = scalar_lea.vmem %s76_s28, 32 }
  0x1c   :  { %p3003_p6 = scmp.lt.s32.totalorder %s76_s28, %s76_s28  ;;  %p3004_p7 = scmp.lt.s32.totalorder %s3002_s25, %s2998_s3 }
  0x1e   :  { %p3005_p8 = por %p3004_p7, %p3003_p6 }
  0x20   :  { %58 = dma.hbm_to_vmem [thread:$0]  %s3902_s30, 256, %s53_s26, [#allocation6], %s3883_s2, %s3883_s2, %s3884_s29  }
  0x21   :  { %p3006_p9 = pnand %p3005_p8, %p2999_p5 }
  0x23   :  { %3009 = shalt.err (!%p3006_p9)
}
  0x24   :  { %s3903_s1 = sld [smem:[#allocation23_spill]]  ;;  %s3144_s5 = smov [#allocation2]  }
  0x25   :  { %s40_s27 = sshll.u32 %s3144_s5, 4  ;;  %s3145_s6 = smov [#allocation7]   ;;  %s41_s27 = int_to_ptr.vmem [resolvable:$true] %s40_s27 }
  0x26   :  { %s65_s24 = sshll.u32 %s3145_s6, 4  ;;  %s3018_s0 = scalar_lea.vmem %s41_s27, 256  ;;  %s66_s24 = int_to_ptr.vmem [resolvable:$true] %s65_s24 }
  0x27   :  { %p3019_p10 = scmp.ne.s32.totalorder %s41_s27, %s3018_s0  ;;  %p3023_p11 = scmp.lt.s32.totalorder %s41_s27, %s41_s27 }
  0x28   :  { %p3024_p12 = scmp.lt.s32.totalorder %s3018_s0, %s3018_s0 }
  0x2a   :  { %78 = dma.hbm_to_vmem [thread:$0]  %s3903_s1, 16, %s76_s28, [#allocation9]  }
  0x2b   :  { %p3025_p13 = por %p3024_p12, %p3023_p11 }
  0x2d   :  { %p3026_p0 = pnand %p3025_p13, %p3019_p10 }
  0x2f   :  { %3029 = shalt.err (!%p3026_p0)
}
  0x30   :  { %s3904_s30 = sld [smem:[#allocation20_spill]]  ;;  %s3038_s28 = scalar_lea.vmem %s66_s24, 16 }
  0x31   :  { %p3039_p1 = scmp.ne.s32.totalorder %s66_s24, %s3038_s28  ;;  %s3042_s3 = scalar_lea.vmem %s66_s24, 32 }
  0x32   :  { %p3043_p2 = scmp.lt.s32.totalorder %s66_s24, %s66_s24  ;;  %p3044_p3 = scmp.lt.s32.totalorder %s3042_s3, %s3038_s28 }
  0x34   :  { %p3045_p4 = por %p3044_p3, %p3043_p2 }
  0x36   :  { %46 = dma.hbm_to_vmem [thread:$0]  %s3904_s30, 256, %s41_s27, [#allocation3], %s3883_s2, %s3883_s2, %s3884_s29  }
  0x37   :  { %p3046_p5 = pnand %p3045_p4, %p3039_p1 }
  0x39   :  { %3049 = shalt.err (!%p3046_p5)
}
  0x3a   :  { %s3905_s4 = sld [smem:[#allocation22_spill]]  ;;  %s3146_s1 = smov [#allocation10]  }
  0x3b   :  { %s84_s5 = sshll.u32 %s3146_s1, 4  ;;  %s85_s5 = int_to_ptr.vmem [resolvable:$true] %s84_s5 }
  0x3c   :  { %s3058_s6 = scalar_lea.vmem %s85_s5, 256  ;;  %p3063_p7 = scmp.lt.s32.totalorder %s85_s5, %s85_s5 }
  0x3d   :  { %p3059_p6 = scmp.ne.s32.totalorder %s85_s5, %s3058_s6  ;;  %p3064_p8 = scmp.lt.s32.totalorder %s3058_s6, %s3058_s6 }
  0x3f   :  { %p3065_p9 = por %p3064_p8, %p3063_p7 }
  0x40   :  { %68 = dma.hbm_to_vmem [thread:$0]  %s3905_s4, 16, %s66_s24, [#allocation6]  }
  0x41   :  { %p3066_p10 = pnand %p3065_p9, %p3059_p6 }
  0x43   :  { %3069 = shalt.err (!%p3066_p10)
}
  0x44   :  { %s3906_s26 = sld [smem:[#allocation24_spill]] }
  0x4a   :  { %90 = dma.hbm_to_vmem [thread:$0]  %s3906_s26, 256, %s85_s5, [#allocation9], %s3883_s2, %s3883_s2, %s3884_s29  }
  0x4b   :  { %3130 = dma.done.wait [#allocation3], 256  }
  0x4c   :  { %3131 = vsyncadd [#allocation3], 4294967040 }
  0x4d   :  { %3132 = dma.done.wait [#allocation6], 272  }
  0x4e   :  { %3133 = vsyncadd [#allocation6], 4294967024 }
  0x4f   :  { %3134 = dma.done.wait [#allocation9], 272  }
  0x50   :  { %3135 = vsyncadd [#allocation9], 4294967024  ;;  %v141_v0 = vld [vmem:[#allocation2] sm:$0xff]  ;;  %v143_v1 = vld [vmem:[#allocation5] sm:$0xff]  ;;  %vm149_vm0 = vcmask 261120   ;;  %s3907_s30 = sld [smem:[#allocation25_spill]] }
  0x51   :  { %v142_v2 = vld [vmem:[#allocation2 + $0x8] sm:$0xff]  ;;  %v145_v3 = vadd.f32 %v143_v1, %v141_v0  ;;  %v144_v4 = vld [vmem:[#allocation5 + $0x8] sm:$0xff]  ;;  %v3147_v21 = vmov 0.0   ;;  %vm3148_vm1 = vmmov 0   ;;  %v2465_v33 = vld [vmem:[#allocation7] ss:$0 sm:$0xff] }
  0x52   :  { %v146_v5 = vadd.f32 %v144_v4, %v142_v2  ;;  %2625 = vmatprep.subr.bf16.mxu0 %v3147_v21  ;;  %2629 = vmatprep.mubr.msk.bf16.mxu0 %vm3148_vm1, %v3147_v21  ;;  %v2466_v37 = vld [vmem:[#allocation8] ss:$0 sm:$0xff]  ;;  %s3908_s27 = sld [smem:[#allocation26_spill]]  ;;  %s3149_s0 = smov 88   ;;  %vm261_vm2 = vcmask 64512   ;;  %v3367_v56 = vld [vmem:[#allocation10] sm:$0xff] }
  0x53   :  { %v150_v6 = vsel %vm149_vm0, %v145_v3, 0.0  ;;  %2633 = vmatprep.subr.bf16.mxu1 %v3147_v21  ;;  %2635 = vmatprep.mubr.msk.bf16.mxu1 %vm3148_vm1, %v3147_v21  ;;  %s3150_s26 = smov 96   ;;  %s3151_s24 = smov 120   ;;  %vm313_vm3 = vcmask 130048   ;;  %v3370_v61 = vld [vmem:[#allocation10 + $0x8] sm:$0xff]  ;;  %vm516_vm4 = vcmask 1043456  }
  0x54   :  { %151 = vadd.xlane.f32.xlu0 %v150_v6  ;;  %v153_v7 = vsel %vm149_vm0, %v146_v5, 0.0  ;;  %s3890_s7 = smov 64   ;;  %s3889_s28 = smov 80   ;;  %vm1111_vm5 = vcmask 523264   ;;  %vm2387_vm7 = vcmask 17408  }
  0x55   :  { %s3891_s3 = smov 112   ;;  %s3155_s25 = smov 56  }
  0x56   :  { %v197_v18 = vld [vmem:[%s3907_s30 + $0x10] sm:$0xff]  ;;  %v198_v19 = vld [vmem:[%s3907_s30 + $0x18] sm:$0xff]  ;;  %v195_v20 = vld [vmem:[%s3907_s30] sm:$0xff]  ;;  %s3909_s1 = sld [smem:[#allocation27_spill]]  ;;  %s3886_s8 = smov 48  }
  0x57   :  { %v201_v22 = vpack.c.bf16 %v198_v19, %v197_v18  ;;  %v196_v23 = vld [vmem:[%s3907_s30 + $0x8] sm:$0xff]  ;;  %s3887_s4 = smov 104   ;;  %s3888_s5 = smov 72  }
  0x58   :  { %154 = vadd.xlane.f32.xlu0 %v153_v7  ;;  %v200_v24 = vpack.c.bf16 %v196_v23, %v195_v20  ;;  %v2467_v43 = vld [vmem:[%s3908_s27] ss:$0 sm:$0xff]  ;;  %s3885_s2 = smov 40   ;;  %s3910_s6 = sld [smem:[#allocation28_spill]] }
  0x59   :  { %2626 = vmatpush3.bf16.msra.mxu0 %v201_v22  ;;  %s3914_s29 = smov 72  }
  0x5a   :  { %2627 = vmatprep.subr.bf16.mxu0 %v3147_v21 }
  0x5d   :  { %2628 = vmatpush3.bf16.msra.mxu0 %v200_v24 }
  0x5e   :  { %2639 = vmatprep.subr.bf16.mxu0 %v3147_v21 }
  0xdd   :  { %v152_v8 = vpop.xlane.xlu0 %151 }
  0xde   :  { %v157_v9 = vmul.f32 0.03125, %v152_v8 }
  0xe0   :  { %v159_v10 = vsub.f32 %v145_v3, %v157_v9 }
  0xe1   :  { %v155_v11 = vpop.xlane.xlu0 %154 }
  0xe2   :  { %v158_v12 = vmul.f32 0.03125, %v155_v11  ;;  %v161_v13 = vmul.f32 %v159_v10, %v159_v10 }
  0xe4   :  { %v160_v14 = vsub.f32 %v146_v5, %v158_v12  ;;  %v163_v15 = vsel %vm149_vm0, %v161_v13, 0.0 }
  0xe5   :  { %164 = vadd.xlane.f32.xlu1 %v163_v15 }
  0xe6   :  { %v162_v16 = vmul.f32 %v160_v14, %v160_v14 }
  0xe8   :  { %v166_v17 = vsel %vm149_vm0, %v162_v16, 0.0 }
  0xe9   :  { %167 = vadd.xlane.f32.xlu1 %v166_v17 }
 0x16e   :  { %v165_v25 = vpop.xlane.xlu1 %164 }
 0x16f   :  { %v169_v26 = vmul.f32 0.03125, %v165_v25 }
 0x171   :  { %v171_v27 = vadd.f32 1e-12, %v169_v26 }
 0x172   :  { %v168_v28 = vpop.xlane.xlu1 %167 }
 0x173   :  { %2870 = vrsqrt.f32 %v171_v27  ;;  %v170_v29 = vmul.f32 0.03125, %v168_v28 }
 0x175   :  { %v172_v30 = vadd.f32 1e-12, %v170_v29 }
 0x177   :  { %2872 = vrsqrt.f32 %v172_v30 }
 0x180   :  { %v2871_v31 = vpop.eup %2870 }
 0x181   :  { %v175_v32 = vmul.f32 %v2871_v31, %v159_v10 }
 0x183   :  { %v183_v36 = vmul.f32 %v2465_v33, %v175_v32 }
 0x184   :  { %v2873_v34 = vpop.eup %2872 }
 0x185   :  { %v176_v35 = vmul.f32 %v2873_v34, %v160_v14  ;;  %v3336_v39 = vadd.f32 %v2466_v37, %v183_v36 }
 0x187   :  { %v184_v38 = vmul.f32 %v2465_v33, %v176_v35 }
 0x189   :  { %v3338_v40 = vadd.f32 %v2466_v37, %v184_v38 }
 0x18b   :  { %v199_v41 = vpack.c.bf16 %v3338_v40, %v3336_v39 }
 0x18d   :  { %2630 = vmatmul.mubr.msk.bf16.vlgmr.msra.gmra.mxu0 %vm149_vm0, %v199_v41 }
 0x18e   :  { %2641 = vmatprep.mubr.msk.bf16.mxu0 %vm3148_vm1, %v3147_v21 }
 0x24d   :  { %v246_v42 = vpop.f32.mrf.mxu0 }
 0x24e   :  { %v247_v46 = vadd.f32 %v2467_v43, %v246_v42 }
 0x24f   :  { %v2631_v44 = vpop.f32.mrf.mxu0 }
 0x251   :  { %v249_v45 = vpop.f32.mrf.mxu0 }
 0x252   :  { %v250_v47 = vadd.f32 %v2467_v43, %v249_v45 }
 0x253   :  { %v2632_v48 = vpop.f32.mrf.mxu0 }
 0x254   :  { %v3348_v49 = vpack.c.bf16 %v250_v47, %v247_v46 }
 0x256   :  { %388 = vrot.lane.b32.xlu1 %v3348_v49, %s3149_s0  ;;  %259 = vrot.lane.b32.xlu0 %v3348_v49, %s3150_s26 }
 0x25a   :  { %386 = vrot.lane.b32.xlu1 %v3348_v49, %s3151_s24 }
 0x2c8   :  { %v260_v50 = vpop.permute.xlu0 %259  ;;  %v389_v52 = vpop.permute.xlu1 %388 }
 0x2c9   :  { %v266_v51 = vsel %vm261_vm2, %v260_v50, 0  ;;  %v394_v53 = vsel %vm261_vm2, %v389_v52, 0 }
 0x2ca   :  { %2634 = vmatpush3.bf16.xpose.msra.mxu1 %v266_v51 }
 0x2cb   :  { %2645 = vmatprep.subr.bf16.mxu1 %v3147_v21 }
 0x2cc   :  { %v387_v54 = vpop.permute.xlu1 %386 }
 0x2d1   :  { %2636 = vmatmul.mubr.msk.bf16.vlgmr.msra.gmra.mxu1 %vm261_vm2, %v3348_v49 }
 0x2d2   :  { %2646 = vmatpush3.bf16.xpose.msra.mxu1 %v394_v53  ;;  %2647 = vmatprep.mubr.msk.bf16.mxu1 %vm3148_vm1, %v3147_v21  ;;  %v253_v53 = vld [vmem:[%s3909_s1] sm:$0xff] }
 0x2d3   :  { %2657 = vmatprep.subr.bf16.mxu1 %v3147_v21 }
 0x2d9   :  { %2648 = vmatmul.mubr.msk.bf16.vlgmr.msra.gmra.mxu1 %vm261_vm2, %v387_v54  ;;  %v385_v54 = vpack.c.bf16 %v253_v53, %v253_v53 }
 0x2da   :  { %2659 = vmatprep.mubr.msk.bf16.mxu1 %vm3148_vm1, %v3147_v21 }
 0x391   :  { %v302_v55 = vpop.f32.mrf.mxu1 }
 0x392   :  { %v309_v57 = vmul.f32 0.35355338, %v302_v55  ;;  %v565_v55 = vsel %vm516_vm4, %v385_v54, 0 }
 0x393   :  { %v2637_v58 = vpop.f32.mrf.mxu1 }
 0x394   :  { %v311_v59 = vadd.f32 %v309_v57, %v3367_v56  ;;  %v254_v57 = vld [vmem:[%s3909_s1 + $0x8] sm:$0xff] }
 0x395   :  { %v305_v60 = vpop.f32.mrf.mxu1  ;;  %v512_v58 = vpack.c.bf16 %v254_v57, %v254_v57 }
 0x396   :  { %v310_v62 = vmul.f32 0.35355338, %v305_v60  ;;  %v314_v63 = vsel %vm313_vm3, %v311_v59, -inf }
 0x397   :  { %315 = vmax.xlane.f32.xlu1 %v314_v63  ;;  %v2638_v0 = vpop.f32.mrf.mxu1 }
 0x398   :  { %v312_v1 = vadd.f32 %v310_v62, %v3370_v61 }
 0x399   :  { %v430_v2 = vpop.f32.mrf.mxu1 }
 0x39a   :  { %v437_v3 = vmul.f32 0.35355338, %v430_v2  ;;  %v317_v4 = vsel %vm313_vm3, %v312_v1, -inf }
 0x39b   :  { %318 = vmax.xlane.f32.xlu0 %v317_v4  ;;  %v2649_v5 = vpop.f32.mrf.mxu1 }
 0x39c   :  { %v439_v6 = vadd.f32 %v437_v3, %v3367_v56 }
 0x39d   :  { %v433_v7 = vpop.f32.mrf.mxu1 }
 0x39e   :  { %v438_v8 = vmul.f32 0.35355338, %v433_v7  ;;  %v441_v9 = vsel %vm313_vm3, %v439_v6, -inf }
 0x39f   :  { %442 = vmax.xlane.f32.xlu0 %v441_v9  ;;  %v2650_v10 = vpop.f32.mrf.mxu1 }
 0x3a0   :  { %v440_v11 = vadd.f32 %v438_v8, %v3370_v61 }
 0x3a2   :  { %v444_v12 = vsel %vm313_vm3, %v440_v11, -inf }
 0x3a3   :  { %445 = vmax.xlane.f32.xlu0 %v444_v12 }
 0x420   :  { %v316_v13 = vpop.xlane.xlu1 %315 }
 0x421   :  { %v320_v14 = vsub.f32 %v311_v59, %v316_v13  ;;  %v518_v59 = vsel %vm516_vm4, %v512_v58, 0 }
 0x422   :  { %2658 = vmatpush3.bf16.msra.mxu1 %v518_v59 }
 0x423   :  { %v322_v15 = vmul.f32 1.442695, %v320_v14  ;;  %2669 = vmatprep.subr.bf16.mxu1 %v3147_v21 }
 0x424   :  { %v319_v16 = vpop.xlane.xlu0 %318 }
 0x425   :  { %2874 = vpow2.f32 %v322_v15  ;;  %v321_v17 = vsub.f32 %v312_v1, %v319_v16 }
 0x427   :  { %v324_v18 = vmul.f32 1.442695, %v321_v17 }
 0x428   :  { %v443_v19 = vpop.xlane.xlu0 %442 }
 0x429   :  { %2876 = vpow2.f32 %v324_v18  ;;  %v447_v20 = vsub.f32 %v439_v6, %v443_v19 }
 0x42b   :  { %v449_v22 = vmul.f32 1.442695, %v447_v20 }
 0x42c   :  { %v446_v23 = vpop.xlane.xlu0 %445 }
 0x42d   :  { %2878 = vpow2.f32 %v449_v22  ;;  %v448_v24 = vsub.f32 %v440_v11, %v446_v23 }
 0x42f   :  { %v451_v25 = vmul.f32 1.442695, %v448_v24 }
 0x431   :  { %2880 = vpow2.f32 %v451_v25 }
 0x432   :  { %v2875_v26 = vpop.eup %2874 }
 0x433   :  { %v326_v27 = vsel %vm313_vm3, %v2875_v26, 0.0 }
 0x434   :  { %327 = vadd.xlane.f32.xlu1 %v326_v27 }
 0x436   :  { %v2877_v28 = vpop.eup %2876 }
 0x437   :  { %v329_v29 = vsel %vm313_vm3, %v2877_v28, 0.0 }
 0x438   :  { %330 = vadd.xlane.f32.xlu0 %v329_v29 }
 0x43a   :  { %v2879_v30 = vpop.eup %2878 }
 0x43b   :  { %v453_v31 = vsel %vm313_vm3, %v2879_v30, 0.0 }
 0x43c   :  { %454 = vadd.xlane.f32.xlu1 %v453_v31 }
 0x43e   :  { %v2881_v32 = vpop.eup %2880 }
 0x43f   :  { %v456_v33 = vsel %vm313_vm3, %v2881_v32, 0.0 }
 0x440   :  { %457 = vadd.xlane.f32.xlu0 %v456_v33 }
 0x44d   :  { %337 = vrot.lane.b32.xlu1 %v3348_v49, %s3890_s7  ;;  %s3916_s7 = smov 48  }
 0x451   :  { %610 = vrot.lane.b32.xlu1 %v3348_v49, %s3889_s28  ;;  %s3915_s28 = smov 104  }
 0x455   :  { %608 = vrot.lane.b32.xlu1 %v3348_v49, %s3891_s3 }
 0x456   :  { %464 = vrot.lane.b32.xlu0 %v3348_v49, %s3155_s25 }
 0x4bd   :  { %v328_v34 = vpop.xlane.xlu1 %327 }
 0x4be   :  { %2882 = vrcp.f32 %v328_v34 }
 0x4c1   :  { %v331_v35 = vpop.xlane.xlu0 %330 }
 0x4c2   :  { %2884 = vrcp.f32 %v331_v35 }
 0x4c5   :  { %v455_v36 = vpop.xlane.xlu1 %454 }
 0x4c6   :  { %2886 = vrcp.f32 %v455_v36 }
 0x4c9   :  { %v338_v37 = vpop.permute.xlu1 %337  ;;  %v458_v38 = vpop.xlane.xlu0 %457 }
 0x4ca   :  { %2888 = vrcp.f32 %v458_v38  ;;  %2640 = vmatpush3.bf16.msra.mxu0 %v338_v37 }
 0x4cb   :  { %2651 = vmatprep.subr.bf16.mxu0 %v3147_v21  ;;  %v2883_v41 = vpop.eup %2882 }
 0x4cc   :  { %v334_v43 = vmul.f32 %v2883_v41, %v2875_v26 }
 0x4cd   :  { %v465_v46 = vpop.permute.xlu0 %464  ;;  %v611_v4 = vpop.permute.xlu1 %610 }
 0x4ce   :  { %v616_v8 = vsel %vm261_vm2, %v611_v4, 0 }
 0x4cf   :  { %v2885_v42 = vpop.eup %2884 }
 0x4d0   :  { %v335_v44 = vmul.f32 %v2885_v42, %v2877_v28 }
 0x4d1   :  { %v609_v9 = vpop.permute.xlu1 %608 }
 0x4d2   :  { %v336_v45 = vpack.c.bf16 %v335_v44, %v334_v43 }
 0x4d3   :  { %v2887_v47 = vpop.eup %2886 }
 0x4d4   :  { %2642 = vmatmul.mubr.msk.bf16.vlgmr.msra.gmra.mxu0 %vm313_vm3, %v336_v45  ;;  %v461_v50 = vmul.f32 %v2887_v47, %v2879_v30 }
 0x4d5   :  { %2652 = vmatpush3.bf16.msra.mxu0 %v465_v46  ;;  %2653 = vmatprep.mubr.msk.bf16.mxu0 %vm3148_vm1, %v3147_v21 }
 0x4d6   :  { %2663 = vmatprep.subr.bf16.mxu0 %v3147_v21 }
 0x4d7   :  { %v2889_v48 = vpop.eup %2888 }
 0x4d8   :  { %v462_v51 = vmul.f32 %v2889_v48, %v2881_v32 }
 0x4da   :  { %v463_v52 = vpack.c.bf16 %v462_v51, %v461_v50 }
 0x4dc   :  { %2654 = vmatmul.mubr.msk.bf16.vlgmr.msra.gmra.mxu0 %vm313_vm3, %v463_v52 }
 0x4dd   :  { %2665 = vmatprep.mubr.msk.bf16.mxu0 %vm3148_vm1, %v3147_v21  ;;  %2664 = vmatpush3.bf16.msra.mxu0 %v565_v55  ;;  %v255_v55 = vld [vmem:[%s3909_s1 + $0x10] sm:$0xff] }
 0x4de   :  { %2675 = vmatprep.subr.bf16.mxu0 %v3147_v21  ;;  %v734_v57 = vpack.c.bf16 %v255_v55, %v255_v55 }
 0x4e0   :  { %v739_v58 = vsel %vm516_vm4, %v734_v57, 0 }
 0x594   :  { %v377_v60 = vpop.f32.mrf.mxu0 }
 0x596   :  { %v2643_v62 = vpop.f32.mrf.mxu0 }
 0x598   :  { %v380_v63 = vpop.f32.mrf.mxu0 }
 0x599   :  { %v384_v0 = vpack.c.bf16 %v380_v63, %v377_v60 }
 0x59a   :  { %v2644_v1 = vpop.f32.mrf.mxu0 }
 0x59b   :  { %2666 = vmatmul.mubr.msk.bf16.vlgmr.msra.gmra.mxu0 %vm261_vm2, %v384_v0 }
 0x59c   :  { %v504_v2 = vpop.f32.mrf.mxu0  ;;  %2677 = vmatprep.mubr.msk.bf16.mxu0 %vm3148_vm1, %v3147_v21 }
 0x59e   :  { %v2655_v3 = vpop.f32.mrf.mxu0 }
 0x5a0   :  { %v507_v5 = vpop.f32.mrf.mxu0 }
 0x5a1   :  { %v511_v6 = vpack.c.bf16 %v507_v5, %v504_v2 }
 0x5a2   :  { %v2656_v7 = vpop.f32.mrf.mxu0 }
 0x5a3   :  { %2660 = vmatmul.mubr.msk.bf16.vlgmr.msra.gmra.mxu1 %vm261_vm2, %v511_v6 }
 0x5a4   :  { %2670 = vmatpush3.bf16.xpose.msra.mxu1 %v616_v8  ;;  %2671 = vmatprep.mubr.msk.bf16.mxu1 %vm3148_vm1, %v3147_v21 }
 0x5a5   :  { %2681 = vmatprep.subr.bf16.mxu1 %v3147_v21 }
 0x5ab   :  { %2672 = vmatmul.mubr.msk.bf16.vlgmr.msra.gmra.mxu1 %vm261_vm2, %v609_v9 }
 0x5ac   :  { %2683 = vmatprep.mubr.msk.bf16.mxu1 %vm3148_vm1, %v3147_v21  ;;  %2682 = vmatpush3.bf16.msra.mxu1 %v739_v58 }
 0x5ad   :  { %2693 = vmatprep.subr.bf16.mxu1 %v3147_v21 }
 0x65b   :  { %v601_v10 = vpop.f32.mrf.mxu0 }
 0x65d   :  { %v2667_v11 = vpop.f32.mrf.mxu0 }
 0x65f   :  { %v604_v12 = vpop.f32.mrf.mxu0 }
 0x661   :  { %v2668_v13 = vpop.f32.mrf.mxu0 }
 0x663   :  { %v554_v14 = vpop.f32.mrf.mxu1 }
 0x664   :  { %v3420_v15 = vadd.f32 %v601_v10, %v554_v14 }
 0x665   :  { %v2661_v16 = vpop.f32.mrf.mxu1 }
 0x667   :  { %v557_v17 = vpop.f32.mrf.mxu1 }
 0x668   :  { %v3422_v18 = vadd.f32 %v604_v12, %v557_v17 }
 0x669   :  { %v2662_v19 = vpop.f32.mrf.mxu1 }
 0x66b   :  { %v652_v20 = vpop.f32.mrf.mxu1 }
 0x66c   :  { %v659_v22 = vmul.f32 0.35355338, %v652_v20 }
 0x66d   :  { %v2673_v23 = vpop.f32.mrf.mxu1 }
 0x66e   :  { %v661_v24 = vadd.f32 %v659_v22, %v3367_v56 }
 0x66f   :  { %v655_v25 = vpop.f32.mrf.mxu1 }
 0x670   :  { %v660_v26 = vmul.f32 0.35355338, %v655_v25  ;;  %v663_v27 = vsel %vm313_vm3, %v661_v24, -inf }
 0x671   :  { %664 = vmax.xlane.f32.xlu1 %v663_v27  ;;  %v2674_v28 = vpop.f32.mrf.mxu1 }
 0x672   :  { %v662_v29 = vadd.f32 %v660_v26, %v3370_v61 }
 0x674   :  { %v666_v30 = vsel %vm313_vm3, %v662_v29, -inf }
 0x675   :  { %667 = vmax.xlane.f32.xlu0 %v666_v30 }
 0x682   :  { %686 = vrot.lane.b32.xlu1 %v3348_v49, %s3886_s8  ;;  %s3917_s8 = smov 40  }
 0x686   :  { %784 = vrot.lane.b32.xlu1 %v3348_v49, %s3887_s4 }
 0x6fa   :  { %v665_v31 = vpop.xlane.xlu1 %664 }
 0x6fb   :  { %v669_v32 = vsub.f32 %v661_v24, %v665_v31 }
 0x6fd   :  { %v671_v33 = vmul.f32 1.442695, %v669_v32 }
 0x6fe   :  { %v687_v34 = vpop.permute.xlu1 %686  ;;  %v668_v35 = vpop.xlane.xlu0 %667 }
 0x6ff   :  { %2890 = vpow2.f32 %v671_v33  ;;  %v670_v36 = vsub.f32 %v662_v29, %v668_v35  ;;  %2676 = vmatpush3.bf16.msra.mxu0 %v687_v34 }
 0x700   :  { %2687 = vmatprep.subr.bf16.mxu0 %v3147_v21 }
 0x701   :  { %v673_v37 = vmul.f32 1.442695, %v670_v36 }
 0x702   :  { %v785_v54 = vpop.permute.xlu1 %784 }
 0x703   :  { %2892 = vpow2.f32 %v673_v37 }
 0x70c   :  { %v2891_v38 = vpop.eup %2890 }
 0x70d   :  { %v675_v41 = vsel %vm313_vm3, %v2891_v38, 0.0 }
 0x70e   :  { %676 = vadd.xlane.f32.xlu0 %v675_v41 }
 0x710   :  { %v2893_v42 = vpop.eup %2892 }
 0x711   :  { %v678_v43 = vsel %vm313_vm3, %v2893_v42, 0.0 }
 0x712   :  { %679 = vadd.xlane.f32.xlu0 %v678_v43 }
 0x728   :  { %786 = vrot.lane.b32.xlu0 %v3348_v49, %s3888_s5 }
 0x797   :  { %v677_v44 = vpop.xlane.xlu0 %676 }
 0x798   :  { %2894 = vrcp.f32 %v677_v44 }
 0x79b   :  { %v680_v45 = vpop.xlane.xlu0 %679 }
 0x79c   :  { %2896 = vrcp.f32 %v680_v45 }
 0x79f   :  { %v787_v51 = vpop.permute.xlu0 %786 }
 0x7a0   :  { %v792_v53 = vsel %vm261_vm2, %v787_v51, 0 }
 0x7a5   :  { %v2895_v46 = vpop.eup %2894 }
 0x7a6   :  { %v683_v48 = vmul.f32 %v2895_v46, %v2891_v38  ;;  %v2481_v46 = vld [vmem:[%s3910_s6] ss:$0 sm:$0xff] }
 0x7a9   :  { %v2897_v47 = vpop.eup %2896 }
 0x7aa   :  { %v684_v50 = vmul.f32 %v2897_v47, %v2893_v42 }
 0x7ac   :  { %v685_v52 = vpack.c.bf16 %v684_v50, %v683_v48 }
 0x7ae   :  { %2678 = vmatmul.mubr.msk.bf16.vlgmr.msra.gmra.mxu0 %vm313_vm3, %v685_v52 }
 0x7af   :  { %2688 = vmatpush3.bf16.xpose.msra.mxu0 %v792_v53  ;;  %2689 = vmatprep.mubr.msk.bf16.mxu0 %vm3148_vm1, %v3147_v21 }
 0x7b0   :  { %2699 = vmatprep.subr.bf16.mxu0 %v3147_v21 }
 0x7b6   :  { %2690 = vmatmul.mubr.msk.bf16.vlgmr.msra.gmra.mxu0 %vm261_vm2, %v785_v54 }
 0x7b7   :  { %2701 = vmatprep.mubr.msk.bf16.mxu0 %vm3148_vm1, %v3147_v21 }
 0x86e   :  { %v726_v59 = vpop.f32.mrf.mxu0 }
 0x870   :  { %v2679_v60 = vpop.f32.mrf.mxu0 }
 0x872   :  { %v729_v62 = vpop.f32.mrf.mxu0 }
 0x873   :  { %v733_v63 = vpack.c.bf16 %v729_v62, %v726_v59 }
 0x874   :  { %v2680_v0 = vpop.f32.mrf.mxu0 }
 0x875   :  { %2684 = vmatmul.mubr.msk.bf16.vlgmr.msra.gmra.mxu1 %vm261_vm2, %v733_v63 }
 0x876   :  { %v828_v1 = vpop.f32.mrf.mxu0  ;;  %2695 = vmatprep.mubr.msk.bf16.mxu1 %vm3148_vm1, %v3147_v21 }
 0x877   :  { %v835_v2 = vmul.f32 0.35355338, %v828_v1 }
 0x878   :  { %v2691_v3 = vpop.f32.mrf.mxu0 }
 0x879   :  { %v837_v4 = vadd.f32 %v835_v2, %v3367_v56 }
 0x87a   :  { %v831_v5 = vpop.f32.mrf.mxu0 }
 0x87b   :  { %v836_v6 = vmul.f32 0.35355338, %v831_v5  ;;  %v839_v7 = vsel %vm313_vm3, %v837_v4, -inf }
 0x87c   :  { %840 = vmax.xlane.f32.xlu1 %v839_v7  ;;  %v2692_v8 = vpop.f32.mrf.mxu0 }
 0x87d   :  { %v838_v9 = vadd.f32 %v836_v6, %v3370_v61  ;;  %v1018_v6 = vld [vmem:[%s3865_s11 + $0x18] sm:$0xff]  ;;  %v1015_v8 = vld [vmem:[%s3865_s11] sm:$0xff] }
 0x87f   :  { %v842_v10 = vsel %vm313_vm3, %v838_v9, -inf }
 0x880   :  { %843 = vmax.xlane.f32.xlu0 %v842_v10 }
 0x905   :  { %v841_v11 = vpop.xlane.xlu1 %840 }
 0x906   :  { %v845_v12 = vsub.f32 %v837_v4, %v841_v11 }
 0x908   :  { %v847_v13 = vmul.f32 1.442695, %v845_v12 }
 0x909   :  { %v844_v14 = vpop.xlane.xlu0 %843 }
 0x90a   :  { %2898 = vpow2.f32 %v847_v13  ;;  %v846_v16 = vsub.f32 %v838_v9, %v844_v14  ;;  %v1016_v9 = vld [vmem:[%s3865_s11 + $0x8] sm:$0xff] }
 0x90b   :  { %v1020_v10 = vpack.c.bf16 %v1016_v9, %v1015_v8 }
 0x90c   :  { %v849_v17 = vmul.f32 1.442695, %v846_v16 }
 0x90e   :  { %2900 = vpow2.f32 %v849_v17 }
 0x917   :  { %v2899_v19 = vpop.eup %2898 }
 0x918   :  { %v851_v20 = vsel %vm313_vm3, %v2899_v19, 0.0 }
 0x919   :  { %852 = vadd.xlane.f32.xlu0 %v851_v20 }
 0x91b   :  { %v2901_v22 = vpop.eup %2900 }
 0x91c   :  { %v854_v23 = vsel %vm313_vm3, %v2901_v22, 0.0 }
 0x91d   :  { %855 = vadd.xlane.f32.xlu1 %v854_v23 }
 0x92f   :  { %862 = vrot.lane.b32.xlu0 %v3348_v49, %s3885_s2 }
 0x935   :  { %v775_v24 = vpop.f32.mrf.mxu1 }
 0x936   :  { %v782_v25 = vadd.f32 %v775_v24, %v3420_v15  ;;  %v256_v15 = vld [vmem:[%s3909_s1 + $0x18] sm:$0xff] }
 0x937   :  { %v2685_v26 = vpop.f32.mrf.mxu1 }
 0x938   :  { %v2483_v26 = vld [vmem:[%s3864_s10] ss:$0 sm:$0xff] }
 0x939   :  { %v778_v27 = vpop.f32.mrf.mxu1 }
 0x93a   :  { %v783_v28 = vadd.f32 %v778_v27, %v3422_v18  ;;  %v910_v18 = vpack.c.bf16 %v256_v15, %v256_v15  ;;  %v1094_v15 = vld [vmem:[%s3867_s13 + $0x18] sm:$0xff] }
 0x93b   :  { %v2686_v29 = vpop.f32.mrf.mxu1 }
 0x93c   :  { %v915_v37 = vsel %vm516_vm4, %v910_v18, 0 }
 0x93d   :  { %2700 = vmatpush3.bf16.msra.mxu0 %v915_v37  ;;  %v1091_v37 = vld [vmem:[%s3867_s13] sm:$0xff] }
 0x93e   :  { %2713 = vmatprep.subr.bf16.mxu0 %v3147_v21 }
 0x9a2   :  { %v853_v30 = vpop.xlane.xlu0 %852 }
 0x9a3   :  { %2902 = vrcp.f32 %v853_v30 }
 0x9a6   :  { %v856_v31 = vpop.xlane.xlu1 %855  ;;  %v863_v32 = vpop.permute.xlu0 %862 }
 0x9a7   :  { %2904 = vrcp.f32 %v856_v31  ;;  %2694 = vmatpush3.bf16.msra.mxu1 %v863_v32  ;;  %v1097_v31 = vld [vmem:[%s3867_s13 + $0x30] sm:$0xff]  ;;  %v1098_v32 = vld [vmem:[%s3867_s13 + $0x38] sm:$0xff] }
 0x9a8   :  { %2705 = vmatprep.subr.bf16.mxu1 %v3147_v21 }
 0x9b0   :  { %v2903_v33 = vpop.eup %2902 }
 0x9b1   :  { %v859_v35 = vmul.f32 %v2903_v33, %v2899_v19  ;;  %v1103_v33 = vpack.c.bf16 %v1098_v32, %v1097_v31  ;;  %v2490_v32 = vld [vmem:[%s3907_s30 + $0x20] sm:$0xff] }
 0x9b4   :  { %v2905_v34 = vpop.eup %2904 }
 0x9b5   :  { %v860_v49 = vmul.f32 %v2905_v34, %v2901_v22  ;;  %v2482_v22 = vld [vmem:[%s3863_s9] ss:$0 sm:$0xff] }
 0x9b6   :  { %v1095_v34 = vld [vmem:[%s3867_s13 + $0x20] sm:$0xff] }
 0x9b7   :  { %v861_v36 = vpack.c.bf16 %v860_v49, %v859_v35  ;;  %v1096_v35 = vld [vmem:[%s3867_s13 + $0x28] sm:$0xff] }
 0x9b8   :  { %v1102_v49 = vpack.c.bf16 %v1096_v35, %v1095_v34 }
 0x9b9   :  { %2696 = vmatmul.mubr.msk.bf16.vlgmr.msra.gmra.mxu1 %vm313_vm3, %v861_v36  ;;  %v1093_v36 = vld [vmem:[%s3867_s13 + $0x10] sm:$0xff] }
 0x9ba   :  { %2709 = vmatprep.mubr.msk.bf16.mxu1 %vm3148_vm1, %v3147_v21  ;;  %v1101_v18 = vpack.c.bf16 %v1094_v15, %v1093_v36 }
 0xa79   :  { %v902_v38 = vpop.f32.mrf.mxu1 }
 0xa7b   :  { %v2697_v41 = vpop.f32.mrf.mxu1 }
 0xa7d   :  { %v905_v42 = vpop.f32.mrf.mxu1 }
 0xa7e   :  { %v909_v43 = vpack.c.bf16 %v905_v42, %v902_v38  ;;  %v1092_v38 = vld [vmem:[%s3867_s13 + $0x8] sm:$0xff]  ;;  %v2484_v42 = vld [vmem:[%s3866_s12] ss:$0 sm:$0xff] }
 0xa7f   :  { %v2698_v44 = vpop.f32.mrf.mxu1  ;;  %v1100_v41 = vpack.c.bf16 %v1092_v38, %v1091_v37 }
 0xa80   :  { %2702 = vmatmul.mubr.msk.bf16.vlgmr.msra.gmra.mxu0 %vm261_vm2, %v909_v43 }
 0xa81   :  { %2721 = vmatprep.mubr.msk.bf16.mxu0 %vm3148_vm1, %v3147_v21  ;;  %2714 = vmatpush3.bf16.msra.mxu0 %v1103_v33  ;;  %v2491_v33 = vld [vmem:[%s3907_s30 + $0x28] sm:$0xff] }
 0xa82   :  { %2715 = vmatprep.subr.bf16.mxu0 %v3147_v21  ;;  %v1208_v34 = vpack.c.bf16 %v2491_v33, %v2490_v32 }
 0xa85   :  { %2716 = vmatpush3.bf16.msra.mxu0 %v1102_v49 }
 0xa86   :  { %2717 = vmatprep.subr.bf16.mxu0 %v3147_v21 }
 0xa89   :  { %2718 = vmatpush3.bf16.msra.mxu0 %v1101_v18 }
 0xa8a   :  { %2719 = vmatprep.subr.bf16.mxu0 %v3147_v21 }
 0xa8d   :  { %2720 = vmatpush3.bf16.msra.mxu0 %v1100_v41 }
 0xa8e   :  { %2739 = vmatprep.subr.bf16.mxu0 %v3147_v21 }
 0xb40   :  { %v951_v45 = vpop.f32.mrf.mxu0 }
 0xb41   :  { %v958_v47 = vadd.f32 %v951_v45, %v782_v25 }
 0xb42   :  { %v2703_v48 = vpop.f32.mrf.mxu0 }
 0xb43   :  { %v967_v50 = vadd.f32 %v2481_v46, %v958_v47 }
 0xb44   :  { %v954_v51 = vpop.f32.mrf.mxu0 }
 0xb45   :  { %v959_v52 = vadd.f32 %v954_v51, %v783_v28  ;;  %v969_v53 = vadd.f32 %v967_v50, %v3336_v39 }
 0xb46   :  { %v2704_v54 = vpop.f32.mrf.mxu0 }
 0xb47   :  { %v968_v55 = vadd.f32 %v2481_v46, %v959_v52  ;;  %v973_v57 = vsel %vm149_vm0, %v969_v53, 0.0 }
 0xb48   :  { %974 = vadd.xlane.f32.xlu1 %v973_v57 }
 0xb49   :  { %v970_v58 = vadd.f32 %v968_v55, %v3338_v40  ;;  %v1017_v40 = vld [vmem:[%s3865_s11 + $0x10] sm:$0xff] }
 0xb4a   :  { %v1021_v7 = vpack.c.bf16 %v1018_v6, %v1017_v40  ;;  %v2486_v40 = vld [vmem:[%s3868_s14] ss:$0 sm:$0xff] }
 0xb4b   :  { %v976_v59 = vsel %vm149_vm0, %v970_v58, 0.0 }
 0xb4c   :  { %977 = vadd.xlane.f32.xlu1 %v976_v59  ;;  %2706 = vmatpush3.bf16.msra.mxu1 %v1021_v7 }
 0xb4d   :  { %2707 = vmatprep.subr.bf16.mxu1 %v3147_v21 }
 0xb50   :  { %2708 = vmatpush3.bf16.msra.mxu1 %v1020_v10 }
 0xb51   :  { %2725 = vmatprep.subr.bf16.mxu1 %v3147_v21 }
 0xbd1   :  { %v975_v60 = vpop.xlane.xlu1 %974 }
 0xbd2   :  { %v979_v62 = vmul.f32 0.03125, %v975_v60 }
 0xbd4   :  { %v981_v63 = vsub.f32 %v969_v53, %v979_v62 }
 0xbd5   :  { %v978_v0 = vpop.xlane.xlu1 %977 }
 0xbd6   :  { %v980_v1 = vmul.f32 0.03125, %v978_v0  ;;  %v983_v2 = vmul.f32 %v981_v63, %v981_v63 }
 0xbd8   :  { %v982_v3 = vsub.f32 %v970_v58, %v980_v1  ;;  %v985_v4 = vsel %vm149_vm0, %v983_v2, 0.0 }
 0xbd9   :  { %986 = vadd.xlane.f32.xlu1 %v985_v4 }
 0xbda   :  { %v984_v39 = vmul.f32 %v982_v3, %v982_v3 }
 0xbdc   :  { %v988_v5 = vsel %vm149_vm0, %v984_v39, 0.0 }
 0xbdd   :  { %989 = vadd.xlane.f32.xlu1 %v988_v5 }
 0xc62   :  { %v987_v11 = vpop.xlane.xlu1 %986 }
 0xc63   :  { %v991_v12 = vmul.f32 0.03125, %v987_v11 }
 0xc65   :  { %v993_v13 = vadd.f32 1e-12, %v991_v12 }
 0xc66   :  { %v990_v14 = vpop.xlane.xlu1 %989 }
 0xc67   :  { %2906 = vrsqrt.f32 %v993_v13  ;;  %v992_v16 = vmul.f32 0.03125, %v990_v14 }
 0xc69   :  { %v994_v17 = vadd.f32 1e-12, %v992_v16 }
 0xc6b   :  { %2908 = vrsqrt.f32 %v994_v17 }
 0xc74   :  { %v2907_v19 = vpop.eup %2906 }
 0xc75   :  { %v997_v20 = vmul.f32 %v2907_v19, %v981_v63 }
 0xc77   :  { %v1005_v25 = vmul.f32 %v2482_v22, %v997_v20 }
 0xc78   :  { %v2909_v23 = vpop.eup %2908 }
 0xc79   :  { %v998_v24 = vmul.f32 %v2909_v23, %v982_v3  ;;  %v1013_v28 = vadd.f32 %v2483_v26, %v1005_v25 }
 0xc7b   :  { %v1006_v27 = vmul.f32 %v2482_v22, %v998_v24 }
 0xc7d   :  { %v3504_v29 = vadd.f32 %v2483_v26, %v1006_v27 }
 0xc7f   :  { %v1019_v30 = vpack.c.bf16 %v3504_v29, %v1013_v28 }
 0xc81   :  { %2710 = vmatmul.mubr.msk.bf16.vlgmr.msra.gmra.mxu1 %vm149_vm0, %v1019_v30  ;;  %v2493_v30 = vld [vmem:[%s3907_s30 + $0x38] sm:$0xff] }
 0xc82   :  { %2729 = vmatprep.mubr.msk.bf16.mxu1 %vm3148_vm1, %v3147_v21 }
 0xd41   :  { %v1066_v43 = vpop.f32.mrf.mxu1 }
 0xd42   :  { %v1067_v44 = vadd.f32 %v2484_v42, %v1066_v43 }
 0xd43   :  { %v2711_v45 = vpop.f32.mrf.mxu1 }
 0xd44   :  { %v1073_v46 = vmul.f32 %v1067_v44, %v1067_v44 }
 0xd45   :  { %v1069_v47 = vpop.f32.mrf.mxu1 }
 0xd46   :  { %v1075_v48 = vmul.f32 %v1073_v46, %v1067_v44  ;;  %v1070_v50 = vadd.f32 %v2484_v42, %v1069_v47  ;;  %v2488_v42 = vld [vmem:[%s3869_s15] ss:$0 sm:$0xff] }
 0xd47   :  { %v2712_v51 = vpop.f32.mrf.mxu1  ;;  %v2489_v46 = vld [vmem:[%s3870_s16] ss:$0 sm:$0xff] }
 0xd48   :  { %v1077_v52 = vmul.f32 0.044715, %v1075_v48  ;;  %v1074_v53 = vmul.f32 %v1070_v50, %v1070_v50 }
 0xd4a   :  { %v1079_v54 = vadd.f32 %v1077_v52, %v1067_v44  ;;  %v1076_v55 = vmul.f32 %v1074_v53, %v1070_v50  ;;  %v2495_v53 = vld [vmem:[%s3908_s27 + $0x1] ss:$0 sm:$0xff]  ;;  %s3911_s27 = smov 112  }
 0xd4c   :  { %v1081_v57 = vmul.f32 0.7978846, %v1079_v54  ;;  %v1078_v58 = vmul.f32 0.044715, %v1076_v55 }
 0xd4e   :  { %2910 = vtanh.f32 %v1081_v57  ;;  %v1080_v59 = vadd.f32 %v1078_v58, %v1070_v50 }
 0xd50   :  { %v1082_v60 = vmul.f32 0.7978846, %v1080_v59 }
 0xd52   :  { %2912 = vtanh.f32 %v1082_v60 }
 0xd5b   :  { %v2911_v62 = vpop.eup %2910 }
 0xd5c   :  { %v1085_v63 = vadd.f32 1.0, %v2911_v62 }
 0xd5e   :  { %v1087_v1 = vmul.f32 0.5, %v1085_v63 }
 0xd5f   :  { %v2913_v0 = vpop.eup %2912 }
 0xd60   :  { %v1086_v2 = vadd.f32 1.0, %v2913_v0  ;;  %v1089_v4 = vmul.f32 %v1087_v1, %v1067_v44 }
 0xd62   :  { %v1088_v3 = vmul.f32 0.5, %v1086_v2 }
 0xd64   :  { %v1090_v39 = vmul.f32 %v1088_v3, %v1070_v50 }
 0xd66   :  { %v1099_v5 = vpack.c.bf16 %v1090_v39, %v1089_v4 }
 0xd68   :  { %2722 = vmatmul.mubr.msk.bf16.vlgmr.msra.gmra.mxu0 %vm1111_vm5, %v1099_v5 }
 0xd69   :  { %2741 = vmatprep.mubr.msk.bf16.mxu0 %vm3148_vm1, %v3147_v21 }
 0xe28   :  { %v1149_v6 = vpop.f32.mrf.mxu0 }
 0xe29   :  { %v1150_v7 = vadd.f32 %v2486_v40, %v1149_v6 }
 0xe2a   :  { %v2723_v8 = vpop.f32.mrf.mxu0 }
 0xe2b   :  { %v1156_v9 = vadd.f32 %v1150_v7, %v1013_v28 }
 0xe2c   :  { %v1152_v10 = vpop.f32.mrf.mxu0 }
 0xe2d   :  { %v1153_v11 = vadd.f32 %v2486_v40, %v1152_v10  ;;  %v1160_v12 = vsel %vm149_vm0, %v1156_v9, 0.0 }
 0xe2e   :  { %1161 = vadd.xlane.f32.xlu1 %v1160_v12  ;;  %v2724_v13 = vpop.f32.mrf.mxu0 }
 0xe2f   :  { %v1157_v14 = vadd.f32 %v1153_v11, %v3504_v29  ;;  %v2492_v29 = vld [vmem:[%s3907_s30 + $0x30] sm:$0xff] }
 0xe30   :  { %v1209_v31 = vpack.c.bf16 %v2493_v30, %v2492_v29 }
 0xe31   :  { %v1163_v16 = vsel %vm149_vm0, %v1157_v14, 0.0 }
 0xe32   :  { %1164 = vadd.xlane.f32.xlu1 %v1163_v16  ;;  %2726 = vmatpush3.bf16.msra.mxu1 %v1209_v31 }
 0xe33   :  { %2727 = vmatprep.subr.bf16.mxu1 %v3147_v21 }
 0xe36   :  { %2728 = vmatpush3.bf16.msra.mxu1 %v1208_v34 }
 0xe37   :  { %2733 = vmatprep.subr.bf16.mxu1 %v3147_v21 }
 0xeb7   :  { %v1162_v17 = vpop.xlane.xlu1 %1161 }
 0xeb8   :  { %v1166_v19 = vmul.f32 0.03125, %v1162_v17 }
 0xeba   :  { %v1168_v20 = vsub.f32 %v1156_v9, %v1166_v19 }
 0xebb   :  { %v1165_v22 = vpop.xlane.xlu1 %1164 }
 0xebc   :  { %v1167_v23 = vmul.f32 0.03125, %v1165_v22  ;;  %v1170_v24 = vmul.f32 %v1168_v20, %v1168_v20 }
 0xebe   :  { %v1169_v25 = vsub.f32 %v1157_v14, %v1167_v23  ;;  %v1172_v26 = vsel %vm149_vm0, %v1170_v24, 0.0 }
 0xebf   :  { %1173 = vadd.xlane.f32.xlu0 %v1172_v26 }
 0xec0   :  { %v1171_v27 = vmul.f32 %v1169_v25, %v1169_v25 }
 0xec2   :  { %v1175_v28 = vsel %vm149_vm0, %v1171_v27, 0.0 }
 0xec3   :  { %1176 = vadd.xlane.f32.xlu1 %v1175_v28 }
 0xf48   :  { %v1174_v35 = vpop.xlane.xlu0 %1173 }
 0xf49   :  { %v1178_v49 = vmul.f32 0.03125, %v1174_v35 }
 0xf4b   :  { %v1180_v36 = vadd.f32 1e-12, %v1178_v49 }
 0xf4c   :  { %v1177_v15 = vpop.xlane.xlu1 %1176 }
 0xf4d   :  { %2914 = vrsqrt.f32 %v1180_v36  ;;  %v1179_v18 = vmul.f32 0.03125, %v1177_v15 }
 0xf4f   :  { %v1181_v37 = vadd.f32 1e-12, %v1179_v18 }
 0xf51   :  { %2916 = vrsqrt.f32 %v1181_v37 }
 0xf5a   :  { %v2915_v38 = vpop.eup %2914 }
 0xf5b   :  { %v1184_v41 = vmul.f32 %v2915_v38, %v1168_v20 }
 0xf5d   :  { %v1192_v45 = vmul.f32 %v2488_v42, %v1184_v41 }
 0xf5e   :  { %v2917_v43 = vpop.eup %2916 }
 0xf5f   :  { %v1185_v44 = vmul.f32 %v2917_v43, %v1169_v25  ;;  %v3572_v48 = vadd.f32 %v2489_v46, %v1192_v45 }
 0xf61   :  { %v1193_v47 = vmul.f32 %v2488_v42, %v1185_v44 }
 0xf63   :  { %v3574_v50 = vadd.f32 %v2489_v46, %v1193_v47 }
 0xf65   :  { %v1207_v51 = vpack.c.bf16 %v3574_v50, %v3572_v48 }
 0xf67   :  { %2730 = vmatmul.mubr.msk.bf16.vlgmr.msra.gmra.mxu1 %vm149_vm0, %v1207_v51 }
 0xf68   :  { %2735 = vmatprep.mubr.msk.bf16.mxu1 %vm3148_vm1, %v3147_v21 }
0x1027   :  { %v1255_v52 = vpop.f32.mrf.mxu1 }
0x1028   :  { %v1256_v57 = vadd.f32 %v2495_v53, %v1255_v52 }
0x1029   :  { %v2731_v54 = vpop.f32.mrf.mxu1 }
0x102b   :  { %v1258_v55 = vpop.f32.mrf.mxu1 }
0x102c   :  { %v1259_v58 = vadd.f32 %v2495_v53, %v1258_v55 }
0x102d   :  { %v2732_v59 = vpop.f32.mrf.mxu1 }
0x102e   :  { %v3584_v60 = vpack.c.bf16 %v1259_v58, %v1256_v57 }
0x1030   :  { %1269 = vrot.lane.b32.xlu1 %v3584_v60, %s3150_s26  ;;  %s3913_s26 = smov 80  }
0x1034   :  { %1396 = vrot.lane.b32.xlu1 %v3584_v60, %s3149_s0  ;;  %s3912_s0 = smov 64  }
0x1038   :  { %1394 = vrot.lane.b32.xlu1 %v3584_v60, %s3151_s24 }
0x10a2   :  { %v1270_v62 = vpop.permute.xlu1 %1269 }
0x10a3   :  { %v1275_v63 = vsel %vm261_vm2, %v1270_v62, 0 }
0x10a4   :  { %2734 = vmatpush3.bf16.xpose.msra.mxu1 %v1275_v63  ;;  %v2497_v63 = vld [vmem:[%s3909_s1 + $0x20] sm:$0xff] }
0x10a5   :  { %2745 = vmatprep.subr.bf16.mxu1 %v3147_v21 }
0x10a6   :  { %v1397_v0 = vpop.permute.xlu1 %1396 }
0x10a7   :  { %v1402_v1 = vsel %vm261_vm2, %v1397_v0, 0  ;;  %v1393_v0 = vpack.c.bf16 %v2497_v63, %v2497_v63 }
0x10aa   :  { %v1395_v2 = vpop.permute.xlu1 %1394 }
0x10ab   :  { %2736 = vmatmul.mubr.msk.bf16.vlgmr.msra.gmra.mxu1 %vm261_vm2, %v3584_v60 }
0x10ac   :  { %2746 = vmatpush3.bf16.xpose.msra.mxu1 %v1402_v1  ;;  %2747 = vmatprep.mubr.msk.bf16.mxu1 %vm3148_vm1, %v3147_v21  ;;  %v1572_v1 = vsel %vm516_vm4, %v1393_v0, 0 }
0x10ad   :  { %2757 = vmatprep.subr.bf16.mxu1 %v3147_v21 }
0x10b3   :  { %2748 = vmatmul.mubr.msk.bf16.vlgmr.msra.gmra.mxu1 %vm261_vm2, %v1395_v2  ;;  %v2498_v2 = vld [vmem:[%s3909_s1 + $0x28] sm:$0xff] }
0x10b4   :  { %2759 = vmatprep.mubr.msk.bf16.mxu1 %vm3148_vm1, %v3147_v21 }
0x116b   :  { %v1311_v3 = vpop.f32.mrf.mxu1 }
0x116c   :  { %v1318_v4 = vmul.f32 0.35355338, %v1311_v3  ;;  %v1520_v3 = vpack.c.bf16 %v2498_v2, %v2498_v2 }
0x116d   :  { %v2737_v39 = vpop.f32.mrf.mxu1 }
0x116e   :  { %v1320_v5 = vadd.f32 %v1318_v4, %v3367_v56  ;;  %v1525_v4 = vsel %vm516_vm4, %v1520_v3, 0 }
0x116f   :  { %v1314_v40 = vpop.f32.mrf.mxu1  ;;  %2758 = vmatpush3.bf16.msra.mxu1 %v1525_v4 }
0x1170   :  { %v1319_v6 = vmul.f32 0.35355338, %v1314_v40  ;;  %v1322_v7 = vsel %vm313_vm3, %v1320_v5, -inf  ;;  %2769 = vmatprep.subr.bf16.mxu1 %v3147_v21 }
0x1171   :  { %1323 = vmax.xlane.f32.xlu0 %v1322_v7  ;;  %v2738_v8 = vpop.f32.mrf.mxu1 }
0x1172   :  { %v1321_v9 = vadd.f32 %v1319_v6, %v3370_v61 }
0x1173   :  { %v1438_v10 = vpop.f32.mrf.mxu1 }
0x1174   :  { %v1445_v11 = vmul.f32 0.35355338, %v1438_v10  ;;  %v1325_v12 = vsel %vm313_vm3, %v1321_v9, -inf }
0x1175   :  { %1326 = vmax.xlane.f32.xlu1 %v1325_v12  ;;  %v2749_v13 = vpop.f32.mrf.mxu1 }
0x1176   :  { %v1447_v14 = vadd.f32 %v1445_v11, %v3367_v56 }
0x1177   :  { %v1441_v16 = vpop.f32.mrf.mxu1 }
0x1178   :  { %v1446_v17 = vmul.f32 0.35355338, %v1441_v16  ;;  %v1449_v19 = vsel %vm313_vm3, %v1447_v14, -inf }
0x1179   :  { %1450 = vmax.xlane.f32.xlu0 %v1449_v19  ;;  %v2750_v20 = vpop.f32.mrf.mxu1 }
0x117a   :  { %v1448_v22 = vadd.f32 %v1446_v17, %v3370_v61 }
0x117c   :  { %v1452_v23 = vsel %vm313_vm3, %v1448_v22, -inf }
0x117d   :  { %1453 = vmax.xlane.f32.xlu0 %v1452_v23 }
0x1186   :  { %1472 = vrot.lane.b32.xlu1 %v3584_v60, %s3155_s25 }
0x118a   :  { %1615 = vrot.lane.b32.xlu1 %v3584_v60, %s3911_s27 }
0x11fa   :  { %v1324_v24 = vpop.xlane.xlu0 %1323 }
0x11fb   :  { %v1328_v25 = vsub.f32 %v1320_v5, %v1324_v24 }
0x11fd   :  { %v1330_v56 = vmul.f32 1.442695, %v1328_v25 }
0x11fe   :  { %v1327_v26 = vpop.xlane.xlu1 %1326 }
0x11ff   :  { %2918 = vpow2.f32 %v1330_v56  ;;  %v1329_v27 = vsub.f32 %v1321_v9, %v1327_v26 }
0x1201   :  { %v1332_v28 = vmul.f32 1.442695, %v1329_v27 }
0x1202   :  { %v1451_v29 = vpop.xlane.xlu0 %1450  ;;  %v1473_v54 = vpop.permute.xlu1 %1472 }
0x1203   :  { %2920 = vpow2.f32 %v1332_v28  ;;  %v1455_v30 = vsub.f32 %v1447_v14, %v1451_v29 }
0x1205   :  { %v1457_v61 = vmul.f32 1.442695, %v1455_v30 }
0x1206   :  { %v1454_v31 = vpop.xlane.xlu0 %1453  ;;  %v1616_v16 = vpop.permute.xlu1 %1615 }
0x1207   :  { %2922 = vpow2.f32 %v1457_v61  ;;  %v1456_v32 = vsub.f32 %v1448_v22, %v1454_v31  ;;  %v3656_v61 = vld [vmem:[#allocation10] sm:$0xff] }
0x1209   :  { %v1459_v33 = vmul.f32 1.442695, %v1456_v32 }
0x120b   :  { %2924 = vpow2.f32 %v1459_v33 }
0x120c   :  { %v2919_v34 = vpop.eup %2918 }
0x120d   :  { %v1334_v35 = vsel %vm313_vm3, %v2919_v34, 0.0 }
0x120e   :  { %1335 = vadd.xlane.f32.xlu0 %v1334_v35 }
0x1210   :  { %v2921_v49 = vpop.eup %2920 }
0x1211   :  { %v1337_v36 = vsel %vm313_vm3, %v2921_v49, 0.0 }
0x1212   :  { %1338 = vadd.xlane.f32.xlu0 %v1337_v36 }
0x1214   :  { %v2923_v15 = vpop.eup %2922 }
0x1215   :  { %v1461_v18 = vsel %vm313_vm3, %v2923_v15, 0.0 }
0x1216   :  { %1462 = vadd.xlane.f32.xlu0 %v1461_v18 }
0x1218   :  { %v2925_v37 = vpop.eup %2924 }
0x1219   :  { %v1464_v38 = vsel %vm313_vm3, %v2925_v37, 0.0 }
0x121a   :  { %1465 = vadd.xlane.f32.xlu0 %v1464_v38 }
0x1230   :  { %1345 = vrot.lane.b32.xlu0 %v3584_v60, %s3912_s0 }
0x1234   :  { %1617 = vrot.lane.b32.xlu0 %v3584_v60, %s3913_s26 }
0x1297   :  { %v1336_v41 = vpop.xlane.xlu0 %1335 }
0x1298   :  { %2926 = vrcp.f32 %v1336_v41 }
0x129b   :  { %v1339_v42 = vpop.xlane.xlu0 %1338 }
0x129c   :  { %2928 = vrcp.f32 %v1339_v42 }
0x129f   :  { %v1463_v43 = vpop.xlane.xlu0 %1462 }
0x12a0   :  { %2930 = vrcp.f32 %v1463_v43 }
0x12a3   :  { %v1466_v44 = vpop.xlane.xlu0 %1465 }
0x12a4   :  { %2932 = vrcp.f32 %v1466_v44 }
0x12a5   :  { %v2927_v45 = vpop.eup %2926 }
0x12a6   :  { %v1342_v51 = vmul.f32 %v2927_v45, %v2919_v34 }
0x12a7   :  { %v1346_v46 = vpop.permute.xlu0 %1345 }
0x12a8   :  { %2740 = vmatpush3.bf16.msra.mxu0 %v1346_v46 }
0x12a9   :  { %v2929_v47 = vpop.eup %2928  ;;  %2751 = vmatprep.subr.bf16.mxu0 %v3147_v21 }
0x12aa   :  { %v1343_v52 = vmul.f32 %v2929_v47, %v2921_v49  ;;  %v3660_v49 = vld [vmem:[#allocation10 + $0x8] sm:$0xff] }
0x12ab   :  { %v1618_v10 = vpop.permute.xlu0 %1617 }
0x12ac   :  { %v1344_v53 = vpack.c.bf16 %v1343_v52, %v1342_v51  ;;  %v1623_v14 = vsel %vm261_vm2, %v1618_v10, 0 }
0x12ad   :  { %v2931_v55 = vpop.eup %2930 }
0x12ae   :  { %2742 = vmatmul.mubr.msk.bf16.vlgmr.msra.gmra.mxu0 %vm313_vm3, %v1344_v53  ;;  %v1469_v58 = vmul.f32 %v2931_v55, %v2923_v15 }
0x12af   :  { %2752 = vmatpush3.bf16.msra.mxu0 %v1473_v54  ;;  %2753 = vmatprep.mubr.msk.bf16.mxu0 %vm3148_vm1, %v3147_v21 }
0x12b0   :  { %2763 = vmatprep.subr.bf16.mxu0 %v3147_v21 }
0x12b1   :  { %v2933_v57 = vpop.eup %2932 }
0x12b2   :  { %v1470_v59 = vmul.f32 %v2933_v57, %v2925_v37 }
0x12b4   :  { %v1471_v62 = vpack.c.bf16 %v1470_v59, %v1469_v58 }
0x12b6   :  { %2754 = vmatmul.mubr.msk.bf16.vlgmr.msra.gmra.mxu0 %vm313_vm3, %v1471_v62 }
0x12b7   :  { %2765 = vmatprep.mubr.msk.bf16.mxu0 %vm3148_vm1, %v3147_v21  ;;  %2764 = vmatpush3.bf16.msra.mxu0 %v1572_v1  ;;  %v2499_v1 = vld [vmem:[%s3909_s1 + $0x30] sm:$0xff] }
0x12b8   :  { %2775 = vmatprep.subr.bf16.mxu0 %v3147_v21  ;;  %v1741_v2 = vpack.c.bf16 %v2499_v1, %v2499_v1 }
0x12ba   :  { %v1746_v3 = vsel %vm516_vm4, %v1741_v2, 0 }
0x136e   :  { %v1385_v39 = vpop.f32.mrf.mxu0 }
0x1370   :  { %v2743_v5 = vpop.f32.mrf.mxu0 }
0x1372   :  { %v1388_v40 = vpop.f32.mrf.mxu0 }
0x1373   :  { %v1392_v6 = vpack.c.bf16 %v1388_v40, %v1385_v39 }
0x1374   :  { %v2744_v7 = vpop.f32.mrf.mxu0 }
0x1375   :  { %2766 = vmatmul.mubr.msk.bf16.vlgmr.msra.gmra.mxu0 %vm261_vm2, %v1392_v6 }
0x1376   :  { %v1512_v8 = vpop.f32.mrf.mxu0  ;;  %2777 = vmatprep.mubr.msk.bf16.mxu0 %vm3148_vm1, %v3147_v21 }
0x1378   :  { %v2755_v9 = vpop.f32.mrf.mxu0 }
0x137a   :  { %v1515_v11 = vpop.f32.mrf.mxu0 }
0x137b   :  { %v1519_v12 = vpack.c.bf16 %v1515_v11, %v1512_v8 }
0x137c   :  { %v2756_v13 = vpop.f32.mrf.mxu0 }
0x137d   :  { %2760 = vmatmul.mubr.msk.bf16.vlgmr.msra.gmra.mxu1 %vm261_vm2, %v1519_v12 }
0x137e   :  { %2770 = vmatpush3.bf16.xpose.msra.mxu1 %v1623_v14  ;;  %2771 = vmatprep.mubr.msk.bf16.mxu1 %vm3148_vm1, %v3147_v21 }
0x137f   :  { %2781 = vmatprep.subr.bf16.mxu1 %v3147_v21 }
0x1385   :  { %2772 = vmatmul.mubr.msk.bf16.vlgmr.msra.gmra.mxu1 %vm261_vm2, %v1616_v16 }
0x1386   :  { %2783 = vmatprep.mubr.msk.bf16.mxu1 %vm3148_vm1, %v3147_v21  ;;  %2782 = vmatpush3.bf16.msra.mxu1 %v1746_v3 }
0x1387   :  { %2793 = vmatprep.subr.bf16.mxu1 %v3147_v21 }
0x1435   :  { %v1608_v17 = vpop.f32.mrf.mxu0 }
0x1437   :  { %v2767_v19 = vpop.f32.mrf.mxu0 }
0x1439   :  { %v1611_v20 = vpop.f32.mrf.mxu0 }
0x143b   :  { %v2768_v22 = vpop.f32.mrf.mxu0 }
0x143d   :  { %v1561_v23 = vpop.f32.mrf.mxu1 }
0x143e   :  { %v3652_v24 = vadd.f32 %v1608_v17, %v1561_v23 }
0x143f   :  { %v2761_v25 = vpop.f32.mrf.mxu1 }
0x1441   :  { %v1564_v56 = vpop.f32.mrf.mxu1 }
0x1442   :  { %v3654_v26 = vadd.f32 %v1611_v20, %v1564_v56 }
0x1443   :  { %v2762_v27 = vpop.f32.mrf.mxu1 }
0x1445   :  { %v1659_v28 = vpop.f32.mrf.mxu1 }
0x1446   :  { %v1666_v29 = vmul.f32 0.35355338, %v1659_v28 }
0x1447   :  { %v2773_v30 = vpop.f32.mrf.mxu1 }
0x1448   :  { %v1668_v31 = vadd.f32 %v3656_v61, %v1666_v29 }
0x1449   :  { %v1662_v32 = vpop.f32.mrf.mxu1 }
0x144a   :  { %v1667_v33 = vmul.f32 0.35355338, %v1662_v32  ;;  %v1670_v34 = vsel %vm313_vm3, %v1668_v31, -inf }
0x144b   :  { %1671 = vmax.xlane.f32.xlu0 %v1670_v34  ;;  %v2774_v35 = vpop.f32.mrf.mxu1 }
0x144c   :  { %v1669_v36 = vadd.f32 %v3660_v49, %v1667_v33 }
0x144e   :  { %v1673_v15 = vsel %vm313_vm3, %v1669_v36, -inf }
0x144f   :  { %1674 = vmax.xlane.f32.xlu1 %v1673_v15 }
0x1460   :  { %1793 = vrot.lane.b32.xlu1 %v3584_v60, %s3914_s29 }
0x1464   :  { %1791 = vrot.lane.b32.xlu1 %v3584_v60, %s3915_s28 }
0x14d4   :  { %v1672_v18 = vpop.xlane.xlu0 %1671 }
0x14d5   :  { %v1676_v37 = vsub.f32 %v1668_v31, %v1672_v18 }
0x14d7   :  { %v1678_v38 = vmul.f32 1.442695, %v1676_v37 }
0x14d8   :  { %v1675_v41 = vpop.xlane.xlu1 %1674 }
0x14d9   :  { %2934 = vpow2.f32 %v1678_v38  ;;  %v1677_v42 = vsub.f32 %v1669_v36, %v1675_v41 }
0x14db   :  { %v1680_v43 = vmul.f32 1.442695, %v1677_v42 }
0x14dc   :  { %v1794_v59 = vpop.permute.xlu1 %1793 }
0x14dd   :  { %2936 = vpow2.f32 %v1680_v43  ;;  %v1799_v63 = vsel %vm261_vm2, %v1794_v59, 0 }
0x14e0   :  { %v1792_v0 = vpop.permute.xlu1 %1791 }
0x14e6   :  { %v2935_v44 = vpop.eup %2934 }
0x14e7   :  { %v1682_v45 = vsel %vm313_vm3, %v2935_v44, 0.0 }
0x14e8   :  { %1683 = vadd.xlane.f32.xlu0 %v1682_v45 }
0x14ea   :  { %v2937_v46 = vpop.eup %2936 }
0x14eb   :  { %v1685_v47 = vsel %vm313_vm3, %v2937_v46, 0.0 }
0x14ec   :  { %1686 = vadd.xlane.f32.xlu0 %v1685_v47 }
0x1502   :  { %1693 = vrot.lane.b32.xlu0 %v3584_v60, %s3916_s7 }
0x1571   :  { %v1684_v51 = vpop.xlane.xlu0 %1683 }
0x1572   :  { %2938 = vrcp.f32 %v1684_v51 }
0x1575   :  { %v1687_v52 = vpop.xlane.xlu0 %1686 }
0x1576   :  { %2940 = vrcp.f32 %v1687_v52  ;;  %v2514_v52 = vld [vmem:[%s3910_s6 + $0x1] ss:$0 sm:$0xff] }
0x1579   :  { %v1694_v53 = vpop.permute.xlu0 %1693 }
0x157a   :  { %2776 = vmatpush3.bf16.msra.mxu0 %v1694_v53 }
0x157b   :  { %2787 = vmatprep.subr.bf16.mxu0 %v3147_v21 }
0x157f   :  { %v2939_v54 = vpop.eup %2938 }
0x1580   :  { %v1690_v57 = vmul.f32 %v2939_v54, %v2935_v44 }
0x1583   :  { %v2941_v55 = vpop.eup %2940 }
0x1584   :  { %v1691_v58 = vmul.f32 %v2941_v55, %v2937_v46 }
0x1586   :  { %v1692_v62 = vpack.c.bf16 %v1691_v58, %v1690_v57 }
0x1588   :  { %2778 = vmatmul.mubr.msk.bf16.vlgmr.msra.gmra.mxu0 %vm313_vm3, %v1692_v62 }
0x1589   :  { %2788 = vmatpush3.bf16.xpose.msra.mxu0 %v1799_v63  ;;  %2789 = vmatprep.mubr.msk.bf16.mxu0 %vm3148_vm1, %v3147_v21 }
0x158a   :  { %2799 = vmatprep.subr.bf16.mxu0 %v3147_v21 }
0x1590   :  { %2790 = vmatmul.mubr.msk.bf16.vlgmr.msra.gmra.mxu0 %vm261_vm2, %v1792_v0 }
0x1591   :  { %2801 = vmatprep.mubr.msk.bf16.mxu0 %vm3148_vm1, %v3147_v21 }
0x1648   :  { %v1733_v4 = vpop.f32.mrf.mxu0 }
0x164a   :  { %v2779_v39 = vpop.f32.mrf.mxu0 }
0x164c   :  { %v1736_v5 = vpop.f32.mrf.mxu0 }
0x164d   :  { %v1740_v40 = vpack.c.bf16 %v1736_v5, %v1733_v4 }
0x164e   :  { %v2780_v6 = vpop.f32.mrf.mxu0 }
0x164f   :  { %2784 = vmatmul.mubr.msk.bf16.vlgmr.msra.gmra.mxu1 %vm261_vm2, %v1740_v40 }
0x1650   :  { %v1835_v7 = vpop.f32.mrf.mxu0  ;;  %2795 = vmatprep.mubr.msk.bf16.mxu1 %vm3148_vm1, %v3147_v21 }
0x1651   :  { %v1842_v8 = vmul.f32 0.35355338, %v1835_v7 }
0x1652   :  { %v2791_v9 = vpop.f32.mrf.mxu0 }
0x1653   :  { %v1844_v10 = vadd.f32 %v3656_v61, %v1842_v8 }
0x1654   :  { %v1838_v11 = vpop.f32.mrf.mxu0 }
0x1655   :  { %v1843_v12 = vmul.f32 0.35355338, %v1838_v11  ;;  %v1846_v13 = vsel %vm313_vm3, %v1844_v10, -inf }
0x1656   :  { %1847 = vmax.xlane.f32.xlu1 %v1846_v13  ;;  %v2792_v14 = vpop.f32.mrf.mxu0  ;;  %v2520_v13 = vld [vmem:[%s3865_s11 + $0x28] sm:$0xff] }
0x1657   :  { %v1845_v16 = vadd.f32 %v3660_v49, %v1843_v12  ;;  %v2519_v12 = vld [vmem:[%s3865_s11 + $0x20] sm:$0xff] }
0x1658   :  { %v2031_v14 = vpack.c.bf16 %v2520_v13, %v2519_v12 }
0x1659   :  { %v1849_v17 = vsel %vm313_vm3, %v1845_v16, -inf }
0x165a   :  { %1850 = vmax.xlane.f32.xlu0 %v1849_v17 }
0x1667   :  { %1869 = vrot.lane.b32.xlu1 %v3584_v60, %s3917_s8 }
0x16df   :  { %v1848_v19 = vpop.xlane.xlu1 %1847 }
0x16e0   :  { %v1852_v20 = vsub.f32 %v1844_v10, %v1848_v19  ;;  %v2522_v10 = vld [vmem:[%s3865_s11 + $0x38] sm:$0xff] }
0x16e2   :  { %v1854_v22 = vmul.f32 1.442695, %v1852_v20 }
0x16e3   :  { %v1870_v23 = vpop.permute.xlu1 %1869  ;;  %v1851_v25 = vpop.xlane.xlu0 %1850 }
0x16e4   :  { %2942 = vpow2.f32 %v1854_v22  ;;  %v1853_v56 = vsub.f32 %v1845_v16, %v1851_v25  ;;  %2794 = vmatpush3.bf16.msra.mxu1 %v1870_v23 }
0x16e5   :  { %2805 = vmatprep.subr.bf16.mxu1 %v3147_v21 }
0x16e6   :  { %v1856_v27 = vmul.f32 1.442695, %v1853_v56 }
0x16e8   :  { %2944 = vpow2.f32 %v1856_v27  ;;  %v2517_v27 = vld [vmem:[%s3863_s9 + $0x1] ss:$0 sm:$0xff] }
0x16f1   :  { %v2943_v28 = vpop.eup %2942 }
0x16f2   :  { %v1858_v29 = vsel %vm313_vm3, %v2943_v28, 0.0 }
0x16f3   :  { %1859 = vadd.xlane.f32.xlu0 %v1858_v29 }
0x16f5   :  { %v2945_v30 = vpop.eup %2944 }
0x16f6   :  { %v1861_v61 = vsel %vm313_vm3, %v2945_v30, 0.0 }
0x16f7   :  { %1862 = vadd.xlane.f32.xlu0 %v1861_v61  ;;  %v2518_v61 = vld [vmem:[%s3864_s10 + $0x1] ss:$0 sm:$0xff] }
0x170f   :  { %v1782_v60 = vpop.f32.mrf.mxu1 }
0x1710   :  { %v1789_v31 = vadd.f32 %v1782_v60, %v3652_v24  ;;  %v2500_v24 = vld [vmem:[%s3909_s1 + $0x38] sm:$0xff] }
0x1711   :  { %v2785_v32 = vpop.f32.mrf.mxu1 }
0x1713   :  { %v1785_v33 = vpop.f32.mrf.mxu1 }
0x1714   :  { %v1790_v34 = vadd.f32 %v1785_v33, %v3654_v26  ;;  %v1917_v26 = vpack.c.bf16 %v2500_v24, %v2500_v24  ;;  %v2526_v24 = vld [vmem:[%s3867_s13 + $0x40] sm:$0xff] }
0x1715   :  { %v2786_v35 = vpop.f32.mrf.mxu1 }
0x1716   :  { %v1922_v42 = vsel %vm516_vm4, %v1917_v26, 0  ;;  %v2533_v35 = vld [vmem:[%s3867_s13 + $0x78] sm:$0xff]  ;;  %v2527_v26 = vld [vmem:[%s3867_s13 + $0x48] sm:$0xff] }
0x1717   :  { %2800 = vmatpush3.bf16.msra.mxu0 %v1922_v42  ;;  %v2113_v42 = vpack.c.bf16 %v2527_v26, %v2526_v24 }
0x1718   :  { %2813 = vmatprep.subr.bf16.mxu0 %v3147_v21 }
0x177c   :  { %v1860_v49 = vpop.xlane.xlu0 %1859 }
0x177d   :  { %2946 = vrcp.f32 %v1860_v49 }
0x1780   :  { %v1863_v36 = vpop.xlane.xlu0 %1862 }
0x1781   :  { %2948 = vrcp.f32 %v1863_v36  ;;  %v2530_v36 = vld [vmem:[%s3867_s13 + $0x60] sm:$0xff] }
0x178a   :  { %v2947_v15 = vpop.eup %2946 }
0x178b   :  { %v1866_v37 = vmul.f32 %v2947_v15, %v2943_v28  ;;  %v2531_v15 = vld [vmem:[%s3867_s13 + $0x68] sm:$0xff] }
0x178e   :  { %v2949_v18 = vpop.eup %2948 }
0x178f   :  { %v1867_v38 = vmul.f32 %v2949_v18, %v2945_v30  ;;  %v2115_v18 = vpack.c.bf16 %v2531_v15, %v2530_v36 }
0x1791   :  { %v1868_v41 = vpack.c.bf16 %v1867_v38, %v1866_v37  ;;  %v2528_v37 = vld [vmem:[%s3867_s13 + $0x50] sm:$0xff]  ;;  %v2529_v38 = vld [vmem:[%s3867_s13 + $0x58] sm:$0xff] }
0x1793   :  { %2796 = vmatmul.mubr.msk.bf16.vlgmr.msra.gmra.mxu1 %vm313_vm3, %v1868_v41  ;;  %v2114_v41 = vpack.c.bf16 %v2529_v38, %v2528_v37  ;;  %v2540_v38 = vld [vmem:[%s3870_s16 + $0x1] ss:$0 sm:$0xff] }
0x1794   :  { %2809 = vmatprep.mubr.msk.bf16.mxu1 %vm3148_vm1, %v3147_v21 }
0x1853   :  { %v1909_v43 = vpop.f32.mrf.mxu1 }
0x1855   :  { %v2797_v44 = vpop.f32.mrf.mxu1 }
0x1857   :  { %v1912_v45 = vpop.f32.mrf.mxu1 }
0x1858   :  { %v1916_v46 = vpack.c.bf16 %v1912_v45, %v1909_v43  ;;  %v2524_v43 = vld [vmem:[%s3866_s12 + $0x1] ss:$0 sm:$0xff] }
0x1859   :  { %v2798_v47 = vpop.f32.mrf.mxu1 }
0x185a   :  { %2802 = vmatmul.mubr.msk.bf16.vlgmr.msra.gmra.mxu0 %vm261_vm2, %v1916_v46 }
0x185b   :  { %2821 = vmatprep.mubr.msk.bf16.mxu0 %vm3148_vm1, %v3147_v21 }
0x191a   :  { %v1958_v51 = vpop.f32.mrf.mxu0 }
0x191b   :  { %v1965_v53 = vadd.f32 %v1958_v51, %v1789_v31 }
0x191c   :  { %v2803_v54 = vpop.f32.mrf.mxu0 }
0x191d   :  { %v1975_v55 = vadd.f32 %v2514_v52, %v1965_v53 }
0x191e   :  { %v1961_v57 = vpop.f32.mrf.mxu0 }
0x191f   :  { %v1966_v58 = vadd.f32 %v1961_v57, %v1790_v34  ;;  %v1977_v59 = vadd.f32 %v1975_v55, %v3572_v48  ;;  %v2532_v34 = vld [vmem:[%s3867_s13 + $0x70] sm:$0xff] }
0x1920   :  { %v2804_v62 = vpop.f32.mrf.mxu0  ;;  %v2116_v49 = vpack.c.bf16 %v2533_v35, %v2532_v34 }
0x1921   :  { %v1976_v63 = vadd.f32 %v2514_v52, %v1966_v58  ;;  %v1983_v0 = vsel %vm149_vm0, %v1977_v59, 0.0 }
0x1922   :  { %1984 = vadd.xlane.f32.xlu0 %v1983_v0  ;;  %2814 = vmatpush3.bf16.msra.mxu0 %v2116_v49  ;;  %v2219_v49 = vlaneseq }
0x1923   :  { %v1978_v1 = vadd.f32 %v1976_v63, %v3574_v50  ;;  %v2521_v50 = vld [vmem:[%s3865_s11 + $0x30] sm:$0xff]  ;;  %2815 = vmatprep.subr.bf16.mxu0 %v3147_v21 }
0x1924   :  { %v2032_v11 = vpack.c.bf16 %v2522_v10, %v2521_v50  ;;  %v2220_v36 = vshrl.u32 %v2219_v49, 7 }
0x1925   :  { %v1986_v2 = vsel %vm149_vm0, %v1978_v1, 0.0 }
0x1926   :  { %1987 = vadd.xlane.f32.xlu0 %v1986_v2  ;;  %2806 = vmatpush3.bf16.msra.mxu1 %v2032_v11  ;;  %v2223_v24 = vmul.u32 8, %v2220_v36 }
0x1927   :  { %2807 = vmatprep.subr.bf16.mxu1 %v3147_v21  ;;  %2816 = vmatpush3.bf16.msra.mxu0 %v2115_v18  ;;  %v2539_v18 = vld [vmem:[%s3869_s15 + $0x1] ss:$0 sm:$0xff] }
0x1928   :  { %2817 = vmatprep.subr.bf16.mxu0 %v3147_v21 }
0x192a   :  { %2808 = vmatpush3.bf16.msra.mxu1 %v2031_v14 }
0x192b   :  { %2825 = vmatprep.subr.bf16.mxu1 %v3147_v21  ;;  %2818 = vmatpush3.bf16.msra.mxu0 %v2114_v41  ;;  %v2222_v41 = vand.u32 127, %v2219_v49 }
0x192c   :  { %2819 = vmatprep.subr.bf16.mxu0 %v3147_v21 }
0x192d   :  { %vm2224_vm6 = vcmp.eq.s32.totalorder %v2222_v41, %v2223_v24 }
0x192f   :  { %2820 = vmatpush3.bf16.msra.mxu0 %v2113_v42 }
0x1930   :  { %2839 = vmatprep.subr.bf16.mxu0 %v3147_v21 }
0x19ab   :  { %v1985_v3 = vpop.xlane.xlu0 %1984 }
0x19ac   :  { %v1989_v4 = vmul.f32 0.03125, %v1985_v3 }
0x19ae   :  { %v1991_v39 = vsub.f32 %v1977_v59, %v1989_v4 }
0x19af   :  { %v1988_v5 = vpop.xlane.xlu0 %1987 }
0x19b0   :  { %v1990_v40 = vmul.f32 0.03125, %v1988_v5  ;;  %v1993_v6 = vmul.f32 %v1991_v39, %v1991_v39 }
0x19b2   :  { %v1992_v7 = vsub.f32 %v1978_v1, %v1990_v40  ;;  %v1995_v8 = vsel %vm149_vm0, %v1993_v6, 0.0 }
0x19b3   :  { %1996 = vadd.xlane.f32.xlu0 %v1995_v8 }
0x19b4   :  { %v1994_v48 = vmul.f32 %v1992_v7, %v1992_v7 }
0x19b6   :  { %v1998_v9 = vsel %vm149_vm0, %v1994_v48, 0.0  ;;  %v2535_v48 = vld [vmem:[%s3868_s14 + $0x1] ss:$0 sm:$0xff]  ;;  %s3161_s14 = smov [#allocation11]  }
0x19b7   :  { %1999 = vadd.xlane.f32.xlu0 %v1998_v9  ;;  %s2424_s3 = sshll.u32 %s3161_s14, 4  ;;  %s2425_s3 = int_to_ptr.vmem [resolvable:$true] %s2424_s3 }
0x1a3c   :  { %v1997_v16 = vpop.xlane.xlu0 %1996 }
0x1a3d   :  { %v2001_v17 = vmul.f32 0.03125, %v1997_v16 }
0x1a3f   :  { %v2003_v19 = vadd.f32 1e-12, %v2001_v17 }
0x1a40   :  { %v2000_v20 = vpop.xlane.xlu0 %1999 }
0x1a41   :  { %2950 = vrsqrt.f32 %v2003_v19  ;;  %v2002_v22 = vmul.f32 0.03125, %v2000_v20 }
0x1a43   :  { %v2004_v23 = vadd.f32 1e-12, %v2002_v22 }
0x1a45   :  { %2952 = vrsqrt.f32 %v2004_v23 }
0x1a4e   :  { %v2951_v25 = vpop.eup %2950 }
0x1a4f   :  { %v2007_v56 = vmul.f32 %v2951_v25, %v1991_v39 }
0x1a51   :  { %v2015_v30 = vmul.f32 %v2517_v27, %v2007_v56 }
0x1a52   :  { %v2953_v28 = vpop.eup %2952 }
0x1a53   :  { %v2008_v29 = vmul.f32 %v2953_v28, %v1992_v7  ;;  %v2023_v31 = vadd.f32 %v2518_v61, %v2015_v30 }
0x1a55   :  { %v2016_v60 = vmul.f32 %v2517_v27, %v2008_v29 }
0x1a57   :  { %v3740_v32 = vadd.f32 %v2518_v61, %v2016_v60 }
0x1a59   :  { %v2030_v33 = vpack.c.bf16 %v3740_v32, %v2023_v31 }
0x1a5b   :  { %2810 = vmatmul.mubr.msk.bf16.vlgmr.msra.gmra.mxu1 %vm149_vm0, %v2030_v33 }
0x1a5c   :  { %2827 = vmatprep.mubr.msk.bf16.mxu1 %vm3148_vm1, %v3147_v21 }
0x1b1b   :  { %v2078_v44 = vpop.f32.mrf.mxu1 }
0x1b1c   :  { %v2079_v45 = vadd.f32 %v2524_v43, %v2078_v44 }
0x1b1d   :  { %v2811_v46 = vpop.f32.mrf.mxu1 }
0x1b1e   :  { %v2085_v47 = vmul.f32 %v2079_v45, %v2079_v45 }
0x1b1f   :  { %v2081_v51 = vpop.f32.mrf.mxu1 }
0x1b20   :  { %v2087_v52 = vmul.f32 %v2085_v47, %v2079_v45  ;;  %v2082_v53 = vadd.f32 %v2524_v43, %v2081_v51  ;;  %v2541_v47 = vsel %vm2224_vm6, 1.0, %v3147_v21  ;;  %v2274_v51 = vld [vmem:[%s3871_s17 + $0x10] sm:$0xff] }
0x1b21   :  { %v2812_v54 = vpop.f32.mrf.mxu1 }
0x1b22   :  { %v2089_v55 = vmul.f32 0.044715, %v2087_v52  ;;  %v2086_v57 = vmul.f32 %v2082_v53, %v2082_v53  ;;  %v2275_v52 = vld [vmem:[%s3871_s17 + $0x18] sm:$0xff]  ;;  %v2227_v54 = vpack.c.bf16 %v2541_v47, %v2541_v47 }
0x1b24   :  { %v2091_v58 = vadd.f32 %v2089_v55, %v2079_v45  ;;  %v2088_v59 = vmul.f32 %v2086_v57, %v2082_v53  ;;  %v2278_v55 = vpack.c.bf16 %v2275_v52, %v2274_v51  ;;  %v2272_v57 = vld [vmem:[%s3871_s17] sm:$0xff] }
0x1b26   :  { %v2093_v62 = vmul.f32 0.7978846, %v2091_v58  ;;  %v2090_v63 = vmul.f32 0.044715, %v2088_v59  ;;  %v2273_v58 = vld [vmem:[%s3871_s17 + $0x8] sm:$0xff] }
0x1b27   :  { %v2277_v59 = vpack.c.bf16 %v2273_v58, %v2272_v57 }
0x1b28   :  { %2954 = vtanh.f32 %v2093_v62  ;;  %v2092_v0 = vadd.f32 %v2090_v63, %v2082_v53 }
0x1b2a   :  { %v2094_v1 = vmul.f32 0.7978846, %v2092_v0 }
0x1b2c   :  { %2956 = vtanh.f32 %v2094_v1 }
0x1b35   :  { %v2955_v2 = vpop.eup %2954 }
0x1b36   :  { %v2097_v3 = vadd.f32 1.0, %v2955_v2 }
0x1b38   :  { %v2099_v39 = vmul.f32 0.5, %v2097_v3  ;;  %v2332_v3 = vld [vmem:[%s3873_s19 + $0x10] sm:$0xff] }
0x1b39   :  { %v2957_v4 = vpop.eup %2956 }
0x1b3a   :  { %v2098_v5 = vadd.f32 1.0, %v2957_v4  ;;  %v2101_v6 = vmul.f32 %v2099_v39, %v2079_v45  ;;  %v2333_v4 = vld [vmem:[%s3873_s19 + $0x18] sm:$0xff] }
0x1b3b   :  { %v2336_v39 = vpack.c.bf16 %v2333_v4, %v2332_v3 }
0x1b3c   :  { %v2100_v40 = vmul.f32 0.5, %v2098_v5  ;;  %v2330_v5 = vld [vmem:[%s3873_s19] sm:$0xff] }
0x1b3e   :  { %v2102_v7 = vmul.f32 %v2100_v40, %v2082_v53  ;;  %v2331_v40 = vld [vmem:[%s3873_s19 + $0x8] sm:$0xff] }
0x1b40   :  { %v2112_v8 = vpack.c.bf16 %v2102_v7, %v2101_v6  ;;  %v2335_v6 = vpack.c.bf16 %v2331_v40, %v2330_v5  ;;  %v2543_v7 = vld [vmem:[%s3872_s18] ss:$0 sm:$0xff] }
0x1b42   :  { %2822 = vmatmul.mubr.msk.bf16.vlgmr.msra.gmra.mxu0 %vm1111_vm5, %v2112_v8 }
0x1b43   :  { %2843 = vmatprep.mubr.msk.bf16.mxu0 %vm3148_vm1, %v3147_v21  ;;  %2840 = vmatpush3.bf16.msra.mxu0 %v2336_v39 }
0x1b44   :  { %2841 = vmatprep.subr.bf16.mxu0 %v3147_v21 }
0x1b47   :  { %2842 = vmatpush3.bf16.msra.mxu0 %v2335_v6 }
0x1c02   :  { %v2162_v9 = vpop.f32.mrf.mxu0 }
0x1c03   :  { %v2163_v50 = vadd.f32 %v2535_v48, %v2162_v9 }
0x1c04   :  { %v2823_v10 = vpop.f32.mrf.mxu0 }
0x1c05   :  { %v2169_v11 = vadd.f32 %v2163_v50, %v2023_v31 }
0x1c06   :  { %v2165_v12 = vpop.f32.mrf.mxu0 }
0x1c07   :  { %v2166_v13 = vadd.f32 %v2535_v48, %v2165_v12  ;;  %v2175_v14 = vsel %vm149_vm0, %v2169_v11, 0.0  ;;  %v2545_v12 = vld [vmem:[%s3874_s20] ss:$0 sm:$0xff]  ;;  %s3160_s20 = smov [#allocation12]  }
0x1c08   :  { %2176 = vadd.xlane.f32.xlu1 %v2175_v14  ;;  %v2824_v16 = vpop.f32.mrf.mxu0  ;;  %s2437_s13 = sshll.u32 %s3160_s20, 4  ;;  %s2438_s13 = int_to_ptr.vmem [resolvable:$true] %s2437_s13 }
0x1c09   :  { %v2170_v17 = vadd.f32 %v2166_v13, %v3740_v32  ;;  %s3070_s8 = scalar_lea.vmem %s2438_s13, 32  ;;  %p3075_p12 = scmp.lt.s32.totalorder %s2438_s13, %s2438_s13 }
0x1c0a   :  { %p3071_p11 = scmp.ne.s32.totalorder %s2438_s13, %s3070_s8  ;;  %p3076_p13 = scmp.lt.s32.totalorder %s3070_s8, %s3070_s8 }
0x1c0b   :  { %v2178_v19 = vsel %vm149_vm0, %v2170_v17, 0.0 }
0x1c0c   :  { %2179 = vadd.xlane.f32.xlu0 %v2178_v19  ;;  %p3077_p0 = por %p3076_p13, %p3075_p12 }
0x1c0e   :  { %p3078_p1 = pnand %p3077_p0, %p3071_p11 }
0x1c91   :  { %v2177_v20 = vpop.xlane.xlu1 %2176 }
0x1c92   :  { %v2181_v22 = vmul.f32 0.03125, %v2177_v20 }
0x1c94   :  { %v2183_v23 = vsub.f32 %v2169_v11, %v2181_v22 }
0x1c95   :  { %v2180_v25 = vpop.xlane.xlu0 %2179 }
0x1c96   :  { %v2182_v56 = vmul.f32 0.03125, %v2180_v25  ;;  %v2185_v27 = vmul.f32 %v2183_v23, %v2183_v23 }
0x1c98   :  { %v2184_v28 = vsub.f32 %v2170_v17, %v2182_v56  ;;  %v2187_v29 = vsel %vm149_vm0, %v2185_v27, 0.0  ;;  %v2401_v56 = vld [vmem:[%s3875_s21] sm:$0x3] }
0x1c99   :  { %2188 = vadd.xlane.f32.xlu0 %v2187_v29 }
0x1c9a   :  { %v2186_v30 = vmul.f32 %v2184_v28, %v2184_v28 }
0x1c9c   :  { %v2190_v61 = vsel %vm149_vm0, %v2186_v30, 0.0 }
0x1c9d   :  { %2191 = vadd.xlane.f32.xlu0 %v2190_v61 }
0x1d22   :  { %v2189_v60 = vpop.xlane.xlu0 %2188 }
0x1d23   :  { %v2193_v31 = vmul.f32 0.03125, %v2189_v60 }
0x1d25   :  { %v2195_v32 = vadd.f32 1e-12, %v2193_v31 }
0x1d26   :  { %v2192_v33 = vpop.xlane.xlu0 %2191 }
0x1d27   :  { %2958 = vrsqrt.f32 %v2195_v32  ;;  %v2194_v34 = vmul.f32 0.03125, %v2192_v33 }
0x1d29   :  { %v2196_v35 = vadd.f32 1e-12, %v2194_v34 }
0x1d2b   :  { %2960 = vrsqrt.f32 %v2196_v35 }
0x1d34   :  { %v2959_v15 = vpop.eup %2958 }
0x1d35   :  { %v2199_v37 = vmul.f32 %v2959_v15, %v2183_v23 }
0x1d37   :  { %v2207_v26 = vmul.f32 %v2539_v18, %v2199_v37 }
0x1d38   :  { %v2961_v42 = vpop.eup %2960 }
0x1d39   :  { %v2200_v43 = vmul.f32 %v2961_v42, %v2184_v28  ;;  %v2215_v44 = vadd.f32 %v2540_v38, %v2207_v26 }
0x1d3b   :  { %v2208_v45 = vmul.f32 %v2539_v18, %v2200_v43  ;;  %2217 = vst.msk [vmem:[#allocation11] sm:$0xff] %vm149_vm0, %v2215_v44 }
0x1d3d   :  { %v2216_v46 = vadd.f32 %v2540_v38, %v2208_v45 }
0x1d3f   :  { %v2228_v53 = vpack.c.bf16 %v2216_v46, %v2215_v44  ;;  %2218 = vst.msk [vmem:[#allocation11 + $0x8] sm:$0xff] %vm149_vm0, %v2216_v46 }
0x1d41   :  { %2826 = vmatpush3.bf16.msra.mxu1 %v2228_v53 }
0x1d42   :  { %2831 = vmatprep.subr.bf16.mxu1 %v3147_v21 }
0x1d44   :  { %2828 = vmatmul.mubr.msk.bf16.vlgmr.msra.gmra.mxu1 %vm313_vm3, %v2227_v54 }
0x1d45   :  { %2832 = vmatpush3.bf16.msra.mxu1 %v2278_v55  ;;  %2835 = vmatprep.mubr.msk.bf16.mxu1 %vm3148_vm1, %v3147_v21 }
0x1d46   :  { %2833 = vmatprep.subr.bf16.mxu1 %v3147_v21 }
0x1d49   :  { %2834 = vmatpush3.bf16.msra.mxu1 %v2277_v59 }
0x1e04   :  { %v2266_v62 = vpop.f32.mrf.mxu1 }
0x1e05   :  { %v2276_v63 = vpack.c.bf16 %v2266_v62, %v2266_v62 }
0x1e06   :  { %v2829_v0 = vpop.f32.mrf.mxu1 }
0x1e07   :  { %2836 = vmatmul.mubr.msk.bf16.vlgmr.msra.gmra.mxu1 %vm149_vm0, %v2276_v63 }
0x1e08   :  { %v2269_v1 = vpop.f32.mrf.mxu1 }
0x1e0a   :  { %v2830_v2 = vpop.f32.mrf.mxu1 }
0x1ec7   :  { %v2323_v8 = vpop.f32.mrf.mxu1 }
0x1ec8   :  { %v2324_v48 = vadd.f32 %v2543_v7, %v2323_v8 }
0x1ec9   :  { %v2837_v9 = vpop.f32.mrf.mxu1 }
0x1eca   :  { %2962 = vtanh.f32 %v2324_v48 }
0x1ecb   :  { %v2326_v50 = vpop.f32.mrf.mxu1 }
0x1ecd   :  { %v2838_v21 = vpop.f32.mrf.mxu1 }
0x1ed7   :  { %v2963_v10 = vpop.eup %2962 }
0x1ed8   :  { %v2334_v11 = vpack.c.bf16 %v2963_v10, %v2963_v10 }
0x1eda   :  { %2844 = vmatmul.mubr.msk.bf16.vlgmr.msra.gmra.mxu0 %vm149_vm0, %v2334_v11 }
0x1f9a   :  { %v2381_v13 = vpop.f32.mrf.mxu0 }
0x1f9b   :  { %v2382_v14 = vadd.f32 %v2545_v12, %v2381_v13 }
0x1f9c   :  { %v2845_v16 = vpop.f32.mrf.mxu0 }
0x1f9d   :  { %v2389_v17 = vsel %vm2387_vm7, %v2382_v14, -inf  ;;  %2388 = vst.msk [vmem:[#allocation12] sm:$0x3] %vm2387_vm7, %v2382_v14  ;;  %v2402_v29 = vmul.f32 %v2401_v56, %v2382_v14 }
0x1f9e   :  { %2390 = vmax.xlane.f32.xlu0 %v2389_v17  ;;  %v2384_v19 = vpop.f32.mrf.mxu0 }
0x1f9f   :  { %v2403_v30 = vsel %vm2387_vm7, %v2402_v29, 0.0 }
0x1fa0   :  { %v2846_v20 = vpop.f32.mrf.mxu0 }
0x2027   :  { %v2391_v22 = vpop.xlane.xlu0 %2390 }
0x2028   :  { %v2392_v23 = vsub.f32 %v2382_v14, %v2391_v22 }
0x202a   :  { %v2393_v25 = vmul.f32 1.442695, %v2392_v23 }
0x202c   :  { %2964 = vpow2.f32 %v2393_v25 }
0x2039   :  { %v2965_v27 = vpop.eup %2964 }
0x203a   :  { %v2395_v28 = vsel %vm2387_vm7, %v2965_v27, 0.0 }
0x203b   :  { %2396 = vadd.xlane.f32.xlu0 %v2395_v28 }
0x203f   :  { %2404 = vadd.xlane.f32.xlu0 %v2403_v30 }
0x2040   :  { %3081 = shalt.err (!%p3078_p1)
}
0x2041   :  { %2440 = dma.vmem_to_hbm [thread:$0]  %s2438_s13, 32, %s3877_s23, [#allocation13]  }
0x2042   :  { %s3090_s4 = scalar_lea.vmem %s2425_s3, 256  ;;  %p3095_p3 = scmp.lt.s32.totalorder %s2425_s3, %s2425_s3 }
0x2043   :  { %p3091_p2 = scmp.ne.s32.totalorder %s2425_s3, %s3090_s4  ;;  %p3096_p4 = scmp.lt.s32.totalorder %s3090_s4, %s3090_s4 }
0x2045   :  { %p3097_p5 = por %p3096_p4, %p3095_p3 }
0x2047   :  { %p3098_p6 = pnand %p3097_p5, %p3091_p2 }
0x2049   :  { %3101 = shalt.err (!%p3098_p6)
}
0x204a   :  { %s3918_s15 = smov 8   ;;  %s3919_s27 = smov 128   ;;  %vm2407_vm8 = vcmask 1041408   ;;  %vm2417_vm9 = vcmask 0  }
0x204b   :  { %2430 = dma.vmem_to_hbm [thread:$0]  %s2425_s3, 256, %s3876_s22, [#allocation4], %s3919_s27, %s3919_s27, %s3918_s15  }
0x204c   :  { %s3162_s23 = smov [#allocation14]  }
0x204d   :  { %s2447_s0 = sshll.u32 %s3162_s23, 4  ;;  %s2448_s0 = int_to_ptr.vmem [resolvable:$true] %s2447_s0 }
0x204e   :  { %s3110_s22 = scalar_lea.vmem %s2448_s0, 16  ;;  %s3114_s26 = scalar_lea.vmem %s2448_s0, 32 }
0x204f   :  { %p3111_p7 = scmp.ne.s32.totalorder %s2448_s0, %s3110_s22  ;;  %p3115_p8 = scmp.lt.s32.totalorder %s2448_s0, %s2448_s0 }
0x2050   :  { %p3116_p9 = scmp.lt.s32.totalorder %s3114_s26, %s3110_s22 }
0x2052   :  { %p3117_p10 = por %p3116_p9, %p3115_p8 }
0x2054   :  { %p3118_p11 = pnand %p3117_p10, %p3111_p7 }
0x20c4   :  { %v2397_v61 = vpop.xlane.xlu0 %2396 }
0x20c5   :  { %2966 = vlog2.f32 %v2397_v61 }
0x20c8   :  { %v2405_v33 = vpop.xlane.xlu0 %2404 }
0x20d2   :  { %v2967_v60 = vpop.eup %2966 }
0x20d3   :  { %v2399_v31 = vmul.f32 0.6931472, %v2967_v60 }
0x20d5   :  { %v2400_v32 = vadd.f32 %v2399_v31, %v2391_v22 }
0x20d7   :  { %v2406_v34 = vsub.f32 %v2400_v32, %v2405_v33 }
0x20d9   :  { %v2408_v35 = vsel %vm2407_vm8, %v2406_v34, 0.0 }
0x20da   :  { %v2409_v49 = vrot.slane %v2408_v35, 4 }
0x20dc   :  { %v2410_v36 = vadd.f32 %v2409_v49, %v2408_v35 }
0x20de   :  { %v2411_v15 = vrot.slane %v2410_v36, 2 }
0x20e0   :  { %v2412_v18 = vadd.f32 %v2411_v15, %v2410_v36 }
0x20e2   :  { %v2413_v37 = vrot.slane %v2412_v18, 1 }
0x20e4   :  { %v2414_v38 = vadd.f32 %v2413_v37, %v2412_v18 }
0x20e6   :  { %v2416_v41 = vmul.f32 0.5, %v2414_v38 }
0x20e8   :  { %2418 = vst.msk [vmem:[#allocation14] sm:$0x1] %vm2417_vm9, %v2416_v41 }
0x20e9   :  { %3121 = shalt.err (!%p3118_p11)
}
0x20ea   :  { %s3920_s24 = sld [smem:[#allocation29_spill]] }
0x20f0   :  { %2450 = dma.vmem_to_hbm [thread:$0]  %s2448_s0, 16, %s3920_s24, [#allocation13]  }
0x20f1   :  { %3136 = dma.done.wait [#allocation4], 256  }
0x20f2   :  { %3137 = vsyncadd [#allocation4], 4294967040 }
0x20f3   :  { %3138 = dma.done.wait [#allocation13], 48  }
0x20f4   :  { %3139 = vsyncadd [#allocation13], 4294967248 }
0x20f5   :  { %2460 = vsyncpa [#allocation3], 1 }
0x20f6   :  { %2461 = vsyncpa [#allocation6], 1 }
0x20f7   :  { %2462 = vsyncpa [#allocation9], 1 }
0x20f8   :  { %2463 = vsyncpa [#allocation4], 1 }
0x20f9   :  { %2464 = vsyncpa [#allocation13], 1 }

</bundles_post_ra>
